<compile_context>
chip_gen: v5e
topology: v5e:2x2
jax: 0.10.0
libtpu: 0.0.40
codegen_flags: <defaults>
</compile_context>

<pallas_src>
import math
import functools

import numpy as np
import jax
import jax.numpy as jnp
from jax.experimental import pallas as pl
from jax.experimental.pallas import tpu as pltpu


# ----------------------------- in-kernel helpers -----------------------------

def _erf(x):
    # Abramowitz & Stegun 7.1.26 polynomial (|abs err| < 1.5e-7): matches the
    # exact-erf GELU of nn.GELU() to ~f32 precision using only ops that lower in
    # Mosaic.  The 1/(1+p*z) is routed through the EUP (approx reciprocal) so
    # the large (T, 4C) GELU does not load the VPU.
    a1, a2, a3, a4, a5 = (0.254829592, -0.284496736, 1.421413741,
                          -1.453152027, 1.061405429)
    p = 0.3275911
    sgn = jnp.where(x >= 0.0, 1.0, -1.0)
    z = jnp.abs(x)
    t = pl.reciprocal(1.0 + p * z, approx=True)
    poly = ((((a5 * t + a4) * t + a3) * t + a2) * t + a1) * t
    return sgn * (1.0 - poly * jnp.exp(-z * z))


def _gelu_exact(x):
    return 0.5 * x * (1.0 + _erf(x * (1.0 / math.sqrt(2.0))))


def _layernorm(x, w, b, eps=1e-5):
    mu = jnp.mean(x, axis=-1, keepdims=True)
    var = jnp.mean((x - mu) ** 2, axis=-1, keepdims=True)
    return (x - mu) * jax.lax.rsqrt(var + eps) * w + b


# --------------------------------- kernel ------------------------------------

def block_kernel(n_head, head_size,
                 x_ref, ln1w_ref, ln1b_ref,
                 wqkv_ref, bqkv_ref, cos_ref, sin_ref,
                 wproj_ref, bproj_ref,
                 ln2w_ref, ln2b_ref, wfc_ref, bfc_ref, wfp_ref, bfp_ref,
                 o_ref):
    C = n_head * head_size
    C2 = C // 2
    hs = head_size
    hs2 = hs // 2
    T = x_ref.shape[0]
    bf16 = jnp.bfloat16

    x = x_ref[...]                                           # (T, C) f32

    # ---- ln_1 (f32 statistics) ----
    h = _layernorm(x, ln1w_ref[...], ln1b_ref[...])

    # ---- fused qkv projection (bf16 MXU operands, f32 accumulation) ----
    # q/k columns were pre-permuted host-side into the rotate-half layout
    # [all even dims | all odd dims] (head-major inside each half) and the
    # 1/sqrt(head_size) attention scale is already folded into the q weights.
    qkv = jnp.dot(h.astype(bf16), wqkv_ref[...],
                  preferred_element_type=jnp.float32) + bqkv_ref[...]
    q = qkv[:, 0 * C:1 * C]
    k = qkv[:, 1 * C:2 * C]
    v = qkv[:, 2 * C:3 * C]                                  # original head layout

    # ---- rotary embeddings: element-wise rotate-half (no matmul, no (C,C) op) ----
    cos = cos_ref[...]                                       # (T, C//2)
    sin = sin_ref[...]
    qa, qb = q[:, :C2], q[:, C2:]
    ka, kb = k[:, :C2], k[:, C2:]
    qra = (qa * cos - qb * sin).astype(bf16)                 # even half, rotated
    qrb = (qb * cos + qa * sin).astype(bf16)                 # odd  half, rotated
    kra = (ka * cos - kb * sin).astype(bf16)
    krb = (kb * cos + ka * sin).astype(bf16)
    v16 = v.astype(bf16)

    # ---- causal mask generated in-kernel (no (T,T) HBM operand), hoisted ----
    row = jax.lax.broadcasted_iota(jnp.int32, (T, T), 0)
    col = jax.lax.broadcasted_iota(jnp.int32, (T, T), 1)
    bias = jnp.where(col <= row, 0.0, -1e30).astype(jnp.float32)

    # ---- per-head attention; heads concatenated, single c_proj matmul ----
    dn = (((1,), (1,)), ((), ()))                            # q @ k^T
    heads = []
    for hd in range(n_head):
        a0, a1 = hd * hs2, (hd + 1) * hs2
        s = (jax.lax.dot_general(qra[:, a0:a1], kra[:, a0:a1], dn,
                                 preferred_element_type=jnp.float32)
             + jax.lax.dot_general(qrb[:, a0:a1], krb[:, a0:a1], dn,
                                   preferred_element_type=jnp.float32))
        s = s + bias                                         # already q-scaled
        s = s - jnp.max(s, axis=-1, keepdims=True)
        p = jnp.exp(s)                                       # EUP
        l = jnp.sum(p, axis=-1, keepdims=True)               # (T, 1) f32
        yh = jnp.dot(p.astype(bf16), v16[:, hd * hs:(hd + 1) * hs],
                     preferred_element_type=jnp.float32)     # (T, hs) f32
        # normalize AFTER the PV matmul: approx reciprocal on (T,1), EUP slot
        heads.append(yh * pl.reciprocal(l, approx=True))

    y = jnp.concatenate(heads, axis=-1).astype(bf16)         # (T, C)
    attn_out = jnp.dot(y, wproj_ref[...],
                       preferred_element_type=jnp.float32) + bproj_ref[...]
    x = x + attn_out                                         # residual (dropout = id)

    # ---- ln_2 + MLP (single wide matmuls; don't split the 4C dim) ----
    h2 = _layernorm(x, ln2w_ref[...], ln2b_ref[...])
    a = jnp.dot(h2.astype(bf16), wfc_ref[...],
                preferred_element_type=jnp.float32) + bfc_ref[...]
    g = _gelu_exact(a)                                       # f32 elementwise
    m = jnp.dot(g.astype(bf16), wfp_ref[...],
                preferred_element_type=jnp.float32) + bfp_ref[...]

    o_ref[...] = x + m                                       # residual (dropout = id)


# --------------------------------- wrapper -----------------------------------

def block_forward(x, attn_mask_bool, params, n_head):
    """x: (B, T, C) f32.  attn_mask_bool is accepted for interface parity; only
    the causal use_cache=False mask is supported and it is regenerated in-kernel."""
    del attn_mask_bool  # TODO(synk): arbitrary masks / KV-cache decode unsupported.
    B, T, C = x.shape
    hs = C // n_head
    hs2 = hs // 2
    C2 = C // 2
    x = x.astype(jnp.float32)
    bf16 = jnp.bfloat16

    # ---- host-side prep: permute W_q / W_k columns into rotate-half layout and
    #      fold the 1/sqrt(head_size) score scale into the q columns. ----
    w_attn = np.asarray(params["w_attn"], np.float32)        # (C, 3C)
    b_attn = np.asarray(params["b_attn"], np.float32).reshape(1, 3 * C)
    perm = np.empty(C, np.int64)
    for h in range(n_head):
        for i in range(hs2):
            perm[h * hs2 + i] = h * hs + 2 * i               # even dims -> 1st half
            perm[C2 + h * hs2 + i] = h * hs + 2 * i + 1      # odd  dims -> 2nd half
    scale = 1.0 / math.sqrt(hs)
    w_qkv = np.concatenate([w_attn[:, :C][:, perm] * scale,
                            w_attn[:, C:2 * C][:, perm],
                            w_attn[:, 2 * C:]], axis=1)
    b_qkv = np.concatenate([b_attn[:, :C][:, perm] * scale,
                            b_attn[:, C:2 * C][:, perm],
                            b_attn[:, 2 * C:]], axis=1)

    # RoPE tables (torchtune RotaryPositionalEmbeddings, base=10000): one column
    # per (head, pair) -> shape (T, C//2), shared by both rotate-half halves.
    theta = 1.0 / (10000.0 ** (np.arange(0, hs, 2, dtype=np.float32) / hs))
    ang = np.arange(T, dtype=np.float32)[:, None] * theta[None, :]    # (T, hs//2)
    cos = np.tile(np.cos(ang), (1, n_head)).astype(np.float32)        # (T, C//2)
    sin = np.tile(np.sin(ang), (1, n_head)).astype(np.float32)

    operands = (
        x,
        params["ln1_w"].astype(jnp.float32), params["ln1_b"].astype(jnp.float32),
        jnp.asarray(w_qkv, dtype=bf16), jnp.asarray(b_qkv, jnp.float32),
        jnp.asarray(cos), jnp.asarray(sin),
        params["w_proj"].astype(bf16), params["b_proj"].astype(jnp.float32),
        params["ln2_w"].astype(jnp.float32), params["ln2_b"].astype(jnp.float32),
        params["w_fc"].astype(bf16), params["b_fc"].astype(jnp.float32),
        params["w_fp"].astype(bf16), params["b_fp"].astype(jnp.float32),
    )

    in_specs = [pl.BlockSpec((None, T, C), lambda b: (b, 0, 0))]
    for op in operands[1:]:
        nd = op.ndim
        # Replicated weights / tables: whole array every grid step.
        in_specs.append(pl.BlockSpec(op.shape, lambda b, _nd=nd: (0,) * _nd))

    # Explicit VMEM budget (pipeline double-buffers the inputs).
    def nbytes(a):
        return int(np.prod(a.shape)) * jnp.dtype(a.dtype).itemsize
    weight_bytes = sum(nbytes(op) for op in operands[1:])
    slab_bytes = 4 * T * C
    interm_bytes = 4 * T * (3 * C + 4 * C + 2 * C) + 3 * 4 * T * T
    vmem_limit = 2 * (weight_bytes + 2 * slab_bytes) + interm_bytes + (4 << 20)
    vmem_limit = int(min(max(vmem_limit, 32 << 20), 100 << 20))

    kernel = functools.partial(block_kernel, n_head, hs)
    return pl.pallas_call(
        kernel,
        out_shape=jax.ShapeDtypeStruct((B, T, C), jnp.float32),
        grid=(B,),
        in_specs=in_specs,
        out_specs=pl.BlockSpec((None, T, C), lambda b: (b, 0, 0)),
        # Residual stream can reuse the input HBM buffer when the caller donates it.
        input_output_aliases={0: 0},
        compiler_params=pltpu.CompilerParams(
            # Batch axis is parallel (feeds both v7x TensorCores when B % 2 == 0).
            dimension_semantics=("parallel",),
            vmem_limit_bytes=vmem_limit),
    )(*operands)


# ------------------------- pure-JAX reference (check) ------------------------

def block_reference(x, mask_bool, params, n_head):
    B, T, C = x.shape
    hs = C // n_head

    def ln(z, w, b):
        mu = jnp.mean(z, axis=-1, keepdims=True)
        var = jnp.mean((z - mu) ** 2, axis=-1, keepdims=True)
        return (z - mu) * jax.lax.rsqrt(var + 1e-5) * w + b

    h = ln(x, params["ln1_w"], params["ln1_b"])
    qkv = h @ params["w_attn"] + params["b_attn"]
    q, k, v = jnp.split(qkv, 3, axis=-1)

    def rope(t):
        tt = t.reshape(B, T, n_head, hs // 2, 2)
        theta = 1.0 / (10000.0 ** (jnp.arange(0, hs, 2, dtype=jnp.float32) / hs))
        ang = jnp.arange(T, dtype=jnp.float32)[:, None] * theta[None, :]
        c = jnp.cos(ang)[None, :, None, :]
        s = jnp.sin(ang)[None, :, None, :]
        x0, x1 = tt[..., 0], tt[..., 1]
        return jnp.stack([x0 * c - x1 * s, x1 * c + x0 * s], -1).reshape(B, T, C)

    q, k = rope(q), rope(k)
    qh = q.reshape(B, T, n_head, hs).transpose(0, 2, 1, 3)
    kh = k.reshape(B, T, n_head, hs).transpose(0, 2, 1, 3)
    vh = v.reshape(B, T, n_head, hs).transpose(0, 2, 1, 3)
    s = jnp.einsum("bhqd,bhkd->bhqk", qh, kh) / math.sqrt(hs)
    s = jnp.where(mask_bool, s, -jnp.inf)
    p = jax.nn.softmax(s, axis=-1)
    y = jnp.einsum("bhqk,bhkd->bhqd", p, vh)
    y = y.transpose(0, 2, 1, 3).reshape(B, T, C)
    x = x + y @ params["w_proj"] + params["b_proj"]

    h2 = ln(x, params["ln2_w"], params["ln2_b"])
    a = h2 @ params["w_fc"] + params["b_fc"]
    g = 0.5 * a * (1.0 + jax.scipy.special.erf(a / jnp.sqrt(2.0)))
    return x + g @ params["w_fp"] + params["b_fp"]


# ----------------------------------- main ------------------------------------

if __name__ == "__main__":
    B, T, C, n_head = 2, 8, 32, 4

    key = jax.random.PRNGKey(0)
    ks = jax.random.split(key, 12)
    f32 = jnp.float32
    params = {
        "ln1_w": 1.0 + 0.1 * jax.random.normal(ks[0], (1, C), f32),
        "ln1_b": 0.1 * jax.random.normal(ks[1], (1, C), f32),
        "w_attn": 0.05 * jax.random.normal(ks[2], (C, 3 * C), f32),
        "b_attn": 0.05 * jax.random.normal(ks[3], (1, 3 * C), f32),
        "w_proj": 0.05 * jax.random.normal(ks[4], (C, C), f32),
        "b_proj": 0.05 * jax.random.normal(ks[5], (1, C), f32),
        "ln2_w": 1.0 + 0.1 * jax.random.normal(ks[6], (1, C), f32),
        "ln2_b": 0.1 * jax.random.normal(ks[7], (1, C), f32),
        "w_fc": 0.05 * jax.random.normal(ks[8], (C, 4 * C), f32),
        "b_fc": 0.05 * jax.random.normal(ks[9], (1, 4 * C), f32),
        "w_fp": 0.05 * jax.random.normal(ks[10], (4 * C, C), f32),
        "b_fp": 0.05 * jax.random.normal(ks[11], (1, C), f32),
    }

    x = jax.random.normal(jax.random.PRNGKey(42), (B, T, C), f32)
    attn_mask = jnp.tril(jnp.ones((T, T), bool))[None, None]   # (1,1,T,T) causal

    out = block_forward(x, attn_mask, params, n_head)
    out = jax.block_until_ready(out)

    ref = jax.block_until_ready(block_reference(x, attn_mask, params, n_head))
    # bf16 matmul operands + approx EUP reciprocals -> slightly looser tolerance
    # than the all-f32 reference.
    np.testing.assert_allclose(np.asarray(out), np.asarray(ref),
                               rtol=2e-2, atol=2e-2)

    print("KERNEL_OK")
</pallas_src>

<mosaic_0001>
module attributes {stable_mosaic.version = 11 : i64} {
  func.func @block_kernel(%arg0: i32, %arg1: memref<1x8x32xf32, #tpu.memory_space<vmem>>, %arg2: memref<1x32xf32, #tpu.memory_space<vmem>>, %arg3: memref<1x32xf32, #tpu.memory_space<vmem>>, %arg4: memref<32x96xbf16, #tpu.memory_space<vmem>>, %arg5: memref<1x96xf32, #tpu.memory_space<vmem>>, %arg6: memref<8x16xf32, #tpu.memory_space<vmem>>, %arg7: memref<8x16xf32, #tpu.memory_space<vmem>>, %arg8: memref<32x32xbf16, #tpu.memory_space<vmem>>, %arg9: memref<1x32xf32, #tpu.memory_space<vmem>>, %arg10: memref<1x32xf32, #tpu.memory_space<vmem>>, %arg11: memref<1x32xf32, #tpu.memory_space<vmem>>, %arg12: memref<32x128xbf16, #tpu.memory_space<vmem>>, %arg13: memref<1x128xf32, #tpu.memory_space<vmem>>, %arg14: memref<128x32xbf16, #tpu.memory_space<vmem>>, %arg15: memref<1x32xf32, #tpu.memory_space<vmem>>, %arg16: memref<1x8x32xf32, #tpu.memory_space<vmem>>) attributes {dimension_semantics = [#tpu.dimension_semantics<parallel>], iteration_bounds = array<i64: 2>, scalar_prefetch = 0 : i64, scratch_operands = 0 : i64, tpu.core_type = #tpu.core_type<tc>, window_params = [{transform_indices = @transform_0, window_bounds = array<i64: 1, 8, 32>}, {pipeline_mode = #tpu.pipeline_mode<synchronous>, transform_indices = @transform_1, window_bounds = array<i64: 1, 32>}, {pipeline_mode = #tpu.pipeline_mode<synchronous>, transform_indices = @transform_2, window_bounds = array<i64: 1, 32>}, {pipeline_mode = #tpu.pipeline_mode<synchronous>, transform_indices = @transform_3, window_bounds = array<i64: 32, 96>}, {pipeline_mode = #tpu.pipeline_mode<synchronous>, transform_indices = @transform_4, window_bounds = array<i64: 1, 96>}, {pipeline_mode = #tpu.pipeline_mode<synchronous>, transform_indices = @transform_5, window_bounds = array<i64: 8, 16>}, {pipeline_mode = #tpu.pipeline_mode<synchronous>, transform_indices = @transform_6, window_bounds = array<i64: 8, 16>}, {pipeline_mode = #tpu.pipeline_mode<synchronous>, transform_indices = @transform_7, window_bounds = array<i64: 32, 32>}, {pipeline_mode = #tpu.pipeline_mode<synchronous>, transform_indices = @transform_8, window_bounds = array<i64: 1, 32>}, {pipeline_mode = #tpu.pipeline_mode<synchronous>, transform_indices = @transform_9, window_bounds = array<i64: 1, 32>}, {pipeline_mode = #tpu.pipeline_mode<synchronous>, transform_indices = @transform_10, window_bounds = array<i64: 1, 32>}, {pipeline_mode = #tpu.pipeline_mode<synchronous>, transform_indices = @transform_11, window_bounds = array<i64: 32, 128>}, {pipeline_mode = #tpu.pipeline_mode<synchronous>, transform_indices = @transform_12, window_bounds = array<i64: 1, 128>}, {pipeline_mode = #tpu.pipeline_mode<synchronous>, transform_indices = @transform_13, window_bounds = array<i64: 128, 32>}, {pipeline_mode = #tpu.pipeline_mode<synchronous>, transform_indices = @transform_14, window_bounds = array<i64: 1, 32>}, {transform_indices = @transform_15, window_bounds = array<i64: 1, 8, 32>}]} {
    %c0 = arith.constant 0 : index
    %c0_0 = arith.constant 0 : index
    %c0_1 = arith.constant 0 : index
    %0 = vector.load %arg1[%c0, %c0_0, %c0_1] : memref<1x8x32xf32, #tpu.memory_space<vmem>>, vector<1x8x32xf32>
    %1 = vector.shape_cast %0 : vector<1x8x32xf32> to vector<8x32xf32>
    %c0_2 = arith.constant 0 : index
    %c0_3 = arith.constant 0 : index
    %2 = vector.load %arg2[%c0_2, %c0_3] : memref<1x32xf32, #tpu.memory_space<vmem>>, vector<1x32xf32>
    %c0_4 = arith.constant 0 : index
    %c0_5 = arith.constant 0 : index
    %3 = vector.load %arg3[%c0_4, %c0_5] : memref<1x32xf32, #tpu.memory_space<vmem>>, vector<1x32xf32>
    %cst = arith.constant dense<0.000000e+00> : vector<8xf32>
    %4 = vector.multi_reduction <add>, %1, %cst [1] : vector<8x32xf32> to vector<8xf32>
    %5 = vector.shape_cast %4 : vector<8xf32> to vector<8x1xf32>
    %cst_6 = arith.constant 3.200000e+01 : f32
    %6 = vector.broadcast %cst_6 : f32 to vector<8x1xf32>
    %7 = arith.divf %5, %6 : vector<8x1xf32>
    %8 = vector.broadcast %7 : vector<8x1xf32> to vector<8x32xf32>
    %9 = arith.subf %1, %8 : vector<8x32xf32>
    %10 = arith.mulf %9, %9 : vector<8x32xf32>
    %cst_7 = arith.constant dense<0.000000e+00> : vector<8xf32>
    %11 = vector.multi_reduction <add>, %10, %cst_7 [1] : vector<8x32xf32> to vector<8xf32>
    %12 = vector.shape_cast %11 : vector<8xf32> to vector<8x1xf32>
    %cst_8 = arith.constant 3.200000e+01 : f32
    %13 = vector.broadcast %cst_8 : f32 to vector<8x1xf32>
    %14 = arith.divf %12, %13 : vector<8x1xf32>
    %15 = vector.broadcast %7 : vector<8x1xf32> to vector<8x32xf32>
    %16 = arith.subf %1, %15 : vector<8x32xf32>
    %cst_9 = arith.constant 9.99999974E-6 : f32
    %17 = vector.broadcast %cst_9 : f32 to vector<8x1xf32>
    %18 = arith.addf %14, %17 : vector<8x1xf32>
    %19 = math.rsqrt %18 : vector<8x1xf32>
    %20 = vector.broadcast %19 : vector<8x1xf32> to vector<8x32xf32>
    %21 = arith.mulf %16, %20 : vector<8x32xf32>
    %22 = vector.broadcast %2 : vector<1x32xf32> to vector<8x32xf32>
    %23 = arith.mulf %21, %22 : vector<8x32xf32>
    %24 = vector.broadcast %3 : vector<1x32xf32> to vector<8x32xf32>
    %25 = arith.addf %23, %24 : vector<8x32xf32>
    %26 = arith.truncf %25 : vector<8x32xf32> to vector<8x32xbf16>
    %c0_10 = arith.constant 0 : index
    %c0_11 = arith.constant 0 : index
    %27 = vector.load %arg4[%c0_10, %c0_11] : memref<32x96xbf16, #tpu.memory_space<vmem>>, vector<32x96xbf16>
    %cst_12 = arith.constant dense<0.000000e+00> : vector<8x96xf32>
    %28 = tpu.matmul %26, %27, %cst_12 {dimension_numbers = #tpu.dot_dimension_numbers<[1], [0], [0], [1], [0, 0, 1, 1], [], []>} : vector<8x32xbf16>, vector<32x96xbf16>, vector<8x96xf32> -> vector<8x96xf32>
    %c0_13 = arith.constant 0 : index
    %c0_14 = arith.constant 0 : index
    %29 = vector.load %arg5[%c0_13, %c0_14] : memref<1x96xf32, #tpu.memory_space<vmem>>, vector<1x96xf32>
    %30 = vector.broadcast %29 : vector<1x96xf32> to vector<8x96xf32>
    %31 = arith.addf %28, %30 : vector<8x96xf32>
    %32 = vector.extract_strided_slice %31 {offsets = [0, 0], sizes = [8, 32], strides = [1, 1]} : vector<8x96xf32> to vector<8x32xf32>
    %33 = vector.extract_strided_slice %31 {offsets = [0, 32], sizes = [8, 32], strides = [1, 1]} : vector<8x96xf32> to vector<8x32xf32>
    %34 = vector.extract_strided_slice %31 {offsets = [0, 64], sizes = [8, 32], strides = [1, 1]} : vector<8x96xf32> to vector<8x32xf32>
    %c0_15 = arith.constant 0 : index
    %c0_16 = arith.constant 0 : index
    %35 = vector.load %arg6[%c0_15, %c0_16] : memref<8x16xf32, #tpu.memory_space<vmem>>, vector<8x16xf32>
    %c0_17 = arith.constant 0 : index
    %c0_18 = arith.constant 0 : index
    %36 = vector.load %arg7[%c0_17, %c0_18] : memref<8x16xf32, #tpu.memory_space<vmem>>, vector<8x16xf32>
    %37 = vector.extract_strided_slice %32 {offsets = [0, 0], sizes = [8, 16], strides = [1, 1]} : vector<8x32xf32> to vector<8x16xf32>
    %38 = vector.extract_strided_slice %32 {offsets = [0, 16], sizes = [8, 16], strides = [1, 1]} : vector<8x32xf32> to vector<8x16xf32>
    %39 = vector.extract_strided_slice %33 {offsets = [0, 0], sizes = [8, 16], strides = [1, 1]} : vector<8x32xf32> to vector<8x16xf32>
    %40 = vector.extract_strided_slice %33 {offsets = [0, 16], sizes = [8, 16], strides = [1, 1]} : vector<8x32xf32> to vector<8x16xf32>
    %41 = arith.mulf %37, %35 : vector<8x16xf32>
    %42 = arith.mulf %38, %36 : vector<8x16xf32>
    %43 = arith.subf %41, %42 : vector<8x16xf32>
    %44 = arith.truncf %43 : vector<8x16xf32> to vector<8x16xbf16>
    %45 = arith.mulf %38, %35 : vector<8x16xf32>
    %46 = arith.mulf %37, %36 : vector<8x16xf32>
    %47 = arith.addf %45, %46 : vector<8x16xf32>
    %48 = arith.truncf %47 : vector<8x16xf32> to vector<8x16xbf16>
    %49 = arith.mulf %39, %35 : vector<8x16xf32>
    %50 = arith.mulf %40, %36 : vector<8x16xf32>
    %51 = arith.subf %49, %50 : vector<8x16xf32>
    %52 = arith.truncf %51 : vector<8x16xf32> to vector<8x16xbf16>
    %53 = arith.mulf %40, %35 : vector<8x16xf32>
    %54 = arith.mulf %39, %36 : vector<8x16xf32>
    %55 = arith.addf %53, %54 : vector<8x16xf32>
    %56 = arith.truncf %55 : vector<8x16xf32> to vector<8x16xbf16>
    %57 = arith.truncf %34 : vector<8x32xf32> to vector<8x32xbf16>
    %58 = tpu.iota {dimensions = array<i32: 0>} : vector<8x8xi32>
    %59 = tpu.iota {dimensions = array<i32: 1>} : vector<8x8xi32>
    %60 = arith.cmpi sle, %59, %58 : vector<8x8xi32>
    %cst_19 = arith.constant 0.000000e+00 : f32
    %cst_20 = arith.constant -1.000000e+30 : f32
    %61 = vector.broadcast %cst_19 : f32 to vector<8x8xf32>
    %62 = vector.broadcast %cst_20 : f32 to vector<8x8xf32>
    %63 = arith.select %60, %61, %62 : vector<8x8xi1>, vector<8x8xf32>
    %64 = vector.extract_strided_slice %44 {offsets = [0, 0], sizes = [8, 4], strides = [1, 1]} : vector<8x16xbf16> to vector<8x4xbf16>
    %65 = vector.extract_strided_slice %52 {offsets = [0, 0], sizes = [8, 4], strides = [1, 1]} : vector<8x16xbf16> to vector<8x4xbf16>
    %cst_21 = arith.constant dense<0.000000e+00> : vector<8x8xf32>
    %66 = tpu.matmul %64, %65, %cst_21 {dimension_numbers = #tpu.dot_dimension_numbers<[1], [1], [0], [0], [0, 0, 1, 0], [], []>} : vector<8x4xbf16>, vector<8x4xbf16>, vector<8x8xf32> -> vector<8x8xf32>
    %67 = vector.extract_strided_slice %48 {offsets = [0, 0], sizes = [8, 4], strides = [1, 1]} : vector<8x16xbf16> to vector<8x4xbf16>
    %68 = vector.extract_strided_slice %56 {offsets = [0, 0], sizes = [8, 4], strides = [1, 1]} : vector<8x16xbf16> to vector<8x4xbf16>
    %cst_22 = arith.constant dense<0.000000e+00> : vector<8x8xf32>
    %69 = tpu.matmul %67, %68, %cst_22 {dimension_numbers = #tpu.dot_dimension_numbers<[1], [1], [0], [0], [0, 0, 1, 0], [], []>} : vector<8x4xbf16>, vector<8x4xbf16>, vector<8x8xf32> -> vector<8x8xf32>
    %70 = arith.addf %66, %69 : vector<8x8xf32>
    %71 = arith.addf %70, %63 : vector<8x8xf32>
    %cst_23 = arith.constant dense<0xFF800000> : vector<8xf32>
    %72 = vector.multi_reduction <maximumf>, %71, %cst_23 [1] : vector<8x8xf32> to vector<8xf32>
    %73 = vector.shape_cast %72 : vector<8xf32> to vector<8x1xf32>
    %74 = vector.broadcast %73 : vector<8x1xf32> to vector<8x8xf32>
    %75 = arith.subf %71, %74 : vector<8x8xf32>
    %76 = math.exp %75 : vector<8x8xf32>
    %cst_24 = arith.constant dense<0.000000e+00> : vector<8xf32>
    %77 = vector.multi_reduction <add>, %76, %cst_24 [1] : vector<8x8xf32> to vector<8xf32>
    %78 = vector.shape_cast %77 : vector<8xf32> to vector<8x1xf32>
    %79 = arith.truncf %76 : vector<8x8xf32> to vector<8x8xbf16>
    %80 = vector.extract_strided_slice %57 {offsets = [0, 0], sizes = [8, 8], strides = [1, 1]} : vector<8x32xbf16> to vector<8x8xbf16>
    %cst_25 = arith.constant dense<0.000000e+00> : vector<8x8xf32>
    %81 = tpu.matmul %79, %80, %cst_25 {dimension_numbers = #tpu.dot_dimension_numbers<[1], [0], [0], [1], [0, 0, 1, 1], [], []>} : vector<8x8xbf16>, vector<8x8xbf16>, vector<8x8xf32> -> vector<8x8xf32>
    %82 = tpu.reciprocal %78 {approx = true} : vector<8x1xf32> -> vector<8x1xf32>
    %83 = vector.broadcast %82 : vector<8x1xf32> to vector<8x8xf32>
    %84 = arith.mulf %81, %83 : vector<8x8xf32>
    %85 = vector.extract_strided_slice %44 {offsets = [0, 4], sizes = [8, 4], strides = [1, 1]} : vector<8x16xbf16> to vector<8x4xbf16>
    %86 = vector.extract_strided_slice %52 {offsets = [0, 4], sizes = [8, 4], strides = [1, 1]} : vector<8x16xbf16> to vector<8x4xbf16>
    %cst_26 = arith.constant dense<0.000000e+00> : vector<8x8xf32>
    %87 = tpu.matmul %85, %86, %cst_26 {dimension_numbers = #tpu.dot_dimension_numbers<[1], [1], [0], [0], [0, 0, 1, 0], [], []>} : vector<8x4xbf16>, vector<8x4xbf16>, vector<8x8xf32> -> vector<8x8xf32>
    %88 = vector.extract_strided_slice %48 {offsets = [0, 4], sizes = [8, 4], strides = [1, 1]} : vector<8x16xbf16> to vector<8x4xbf16>
    %89 = vector.extract_strided_slice %56 {offsets = [0, 4], sizes = [8, 4], strides = [1, 1]} : vector<8x16xbf16> to vector<8x4xbf16>
    %cst_27 = arith.constant dense<0.000000e+00> : vector<8x8xf32>
    %90 = tpu.matmul %88, %89, %cst_27 {dimension_numbers = #tpu.dot_dimension_numbers<[1], [1], [0], [0], [0, 0, 1, 0], [], []>} : vector<8x4xbf16>, vector<8x4xbf16>, vector<8x8xf32> -> vector<8x8xf32>
    %91 = arith.addf %87, %90 : vector<8x8xf32>
    %92 = arith.addf %91, %63 : vector<8x8xf32>
    %cst_28 = arith.constant dense<0xFF800000> : vector<8xf32>
    %93 = vector.multi_reduction <maximumf>, %92, %cst_28 [1] : vector<8x8xf32> to vector<8xf32>
    %94 = vector.shape_cast %93 : vector<8xf32> to vector<8x1xf32>
    %95 = vector.broadcast %94 : vector<8x1xf32> to vector<8x8xf32>
    %96 = arith.subf %92, %95 : vector<8x8xf32>
    %97 = math.exp %96 : vector<8x8xf32>
    %cst_29 = arith.constant dense<0.000000e+00> : vector<8xf32>
    %98 = vector.multi_reduction <add>, %97, %cst_29 [1] : vector<8x8xf32> to vector<8xf32>
    %99 = vector.shape_cast %98 : vector<8xf32> to vector<8x1xf32>
    %100 = arith.truncf %97 : vector<8x8xf32> to vector<8x8xbf16>
    %101 = vector.extract_strided_slice %57 {offsets = [0, 8], sizes = [8, 8], strides = [1, 1]} : vector<8x32xbf16> to vector<8x8xbf16>
    %cst_30 = arith.constant dense<0.000000e+00> : vector<8x8xf32>
    %102 = tpu.matmul %100, %101, %cst_30 {dimension_numbers = #tpu.dot_dimension_numbers<[1], [0], [0], [1], [0, 0, 1, 1], [], []>} : vector<8x8xbf16>, vector<8x8xbf16>, vector<8x8xf32> -> vector<8x8xf32>
    %103 = tpu.reciprocal %99 {approx = true} : vector<8x1xf32> -> vector<8x1xf32>
    %104 = vector.broadcast %103 : vector<8x1xf32> to vector<8x8xf32>
    %105 = arith.mulf %102, %104 : vector<8x8xf32>
    %106 = vector.extract_strided_slice %44 {offsets = [0, 8], sizes = [8, 4], strides = [1, 1]} : vector<8x16xbf16> to vector<8x4xbf16>
    %107 = vector.extract_strided_slice %52 {offsets = [0, 8], sizes = [8, 4], strides = [1, 1]} : vector<8x16xbf16> to vector<8x4xbf16>
    %cst_31 = arith.constant dense<0.000000e+00> : vector<8x8xf32>
    %108 = tpu.matmul %106, %107, %cst_31 {dimension_numbers = #tpu.dot_dimension_numbers<[1], [1], [0], [0], [0, 0, 1, 0], [], []>} : vector<8x4xbf16>, vector<8x4xbf16>, vector<8x8xf32> -> vector<8x8xf32>
    %109 = vector.extract_strided_slice %48 {offsets = [0, 8], sizes = [8, 4], strides = [1, 1]} : vector<8x16xbf16> to vector<8x4xbf16>
    %110 = vector.extract_strided_slice %56 {offsets = [0, 8], sizes = [8, 4], strides = [1, 1]} : vector<8x16xbf16> to vector<8x4xbf16>
    %cst_32 = arith.constant dense<0.000000e+00> : vector<8x8xf32>
    %111 = tpu.matmul %109, %110, %cst_32 {dimension_numbers = #tpu.dot_dimension_numbers<[1], [1], [0], [0], [0, 0, 1, 0], [], []>} : vector<8x4xbf16>, vector<8x4xbf16>, vector<8x8xf32> -> vector<8x8xf32>
    %112 = arith.addf %108, %111 : vector<8x8xf32>
    %113 = arith.addf %112, %63 : vector<8x8xf32>
    %cst_33 = arith.constant dense<0xFF800000> : vector<8xf32>
    %114 = vector.multi_reduction <maximumf>, %113, %cst_33 [1] : vector<8x8xf32> to vector<8xf32>
    %115 = vector.shape_cast %114 : vector<8xf32> to vector<8x1xf32>
    %116 = vector.broadcast %115 : vector<8x1xf32> to vector<8x8xf32>
    %117 = arith.subf %113, %116 : vector<8x8xf32>
    %118 = math.exp %117 : vector<8x8xf32>
    %cst_34 = arith.constant dense<0.000000e+00> : vector<8xf32>
    %119 = vector.multi_reduction <add>, %118, %cst_34 [1] : vector<8x8xf32> to vector<8xf32>
    %120 = vector.shape_cast %119 : vector<8xf32> to vector<8x1xf32>
    %121 = arith.truncf %118 : vector<8x8xf32> to vector<8x8xbf16>
    %122 = vector.extract_strided_slice %57 {offsets = [0, 16], sizes = [8, 8], strides = [1, 1]} : vector<8x32xbf16> to vector<8x8xbf16>
    %cst_35 = arith.constant dense<0.000000e+00> : vector<8x8xf32>
    %123 = tpu.matmul %121, %122, %cst_35 {dimension_numbers = #tpu.dot_dimension_numbers<[1], [0], [0], [1], [0, 0, 1, 1], [], []>} : vector<8x8xbf16>, vector<8x8xbf16>, vector<8x8xf32> -> vector<8x8xf32>
    %124 = tpu.reciprocal %120 {approx = true} : vector<8x1xf32> -> vector<8x1xf32>
    %125 = vector.broadcast %124 : vector<8x1xf32> to vector<8x8xf32>
    %126 = arith.mulf %123, %125 : vector<8x8xf32>
    %127 = vector.extract_strided_slice %44 {offsets = [0, 12], sizes = [8, 4], strides = [1, 1]} : vector<8x16xbf16> to vector<8x4xbf16>
    %128 = vector.extract_strided_slice %52 {offsets = [0, 12], sizes = [8, 4], strides = [1, 1]} : vector<8x16xbf16> to vector<8x4xbf16>
    %cst_36 = arith.constant dense<0.000000e+00> : vector<8x8xf32>
    %129 = tpu.matmul %127, %128, %cst_36 {dimension_numbers = #tpu.dot_dimension_numbers<[1], [1], [0], [0], [0, 0, 1, 0], [], []>} : vector<8x4xbf16>, vector<8x4xbf16>, vector<8x8xf32> -> vector<8x8xf32>
    %130 = vector.extract_strided_slice %48 {offsets = [0, 12], sizes = [8, 4], strides = [1, 1]} : vector<8x16xbf16> to vector<8x4xbf16>
    %131 = vector.extract_strided_slice %56 {offsets = [0, 12], sizes = [8, 4], strides = [1, 1]} : vector<8x16xbf16> to vector<8x4xbf16>
    %cst_37 = arith.constant dense<0.000000e+00> : vector<8x8xf32>
    %132 = tpu.matmul %130, %131, %cst_37 {dimension_numbers = #tpu.dot_dimension_numbers<[1], [1], [0], [0], [0, 0, 1, 0], [], []>} : vector<8x4xbf16>, vector<8x4xbf16>, vector<8x8xf32> -> vector<8x8xf32>
    %133 = arith.addf %129, %132 : vector<8x8xf32>
    %134 = arith.addf %133, %63 : vector<8x8xf32>
    %cst_38 = arith.constant dense<0xFF800000> : vector<8xf32>
    %135 = vector.multi_reduction <maximumf>, %134, %cst_38 [1] : vector<8x8xf32> to vector<8xf32>
    %136 = vector.shape_cast %135 : vector<8xf32> to vector<8x1xf32>
    %137 = vector.broadcast %136 : vector<8x1xf32> to vector<8x8xf32>
    %138 = arith.subf %134, %137 : vector<8x8xf32>
    %139 = math.exp %138 : vector<8x8xf32>
    %cst_39 = arith.constant dense<0.000000e+00> : vector<8xf32>
    %140 = vector.multi_reduction <add>, %139, %cst_39 [1] : vector<8x8xf32> to vector<8xf32>
    %141 = vector.shape_cast %140 : vector<8xf32> to vector<8x1xf32>
    %142 = arith.truncf %139 : vector<8x8xf32> to vector<8x8xbf16>
    %143 = vector.extract_strided_slice %57 {offsets = [0, 24], sizes = [8, 8], strides = [1, 1]} : vector<8x32xbf16> to vector<8x8xbf16>
    %cst_40 = arith.constant dense<0.000000e+00> : vector<8x8xf32>
    %144 = tpu.matmul %142, %143, %cst_40 {dimension_numbers = #tpu.dot_dimension_numbers<[1], [0], [0], [1], [0, 0, 1, 1], [], []>} : vector<8x8xbf16>, vector<8x8xbf16>, vector<8x8xf32> -> vector<8x8xf32>
    %145 = tpu.reciprocal %141 {approx = true} : vector<8x1xf32> -> vector<8x1xf32>
    %146 = vector.broadcast %145 : vector<8x1xf32> to vector<8x8xf32>
    %147 = arith.mulf %144, %146 : vector<8x8xf32>
    %148 = tpu.concatenate %84, %105, %126, %147 in 1 : vector<8x8xf32>, vector<8x8xf32>, vector<8x8xf32>, vector<8x8xf32> -> vector<8x32xf32>
    %149 = arith.truncf %148 : vector<8x32xf32> to vector<8x32xbf16>
    %c0_41 = arith.constant 0 : index
    %c0_42 = arith.constant 0 : index
    %150 = vector.load %arg8[%c0_41, %c0_42] : memref<32x32xbf16, #tpu.memory_space<vmem>>, vector<32x32xbf16>
    %cst_43 = arith.constant dense<0.000000e+00> : vector<8x32xf32>
    %151 = tpu.matmul %149, %150, %cst_43 {dimension_numbers = #tpu.dot_dimension_numbers<[1], [0], [0], [1], [0, 0, 1, 1], [], []>} : vector<8x32xbf16>, vector<32x32xbf16>, vector<8x32xf32> -> vector<8x32xf32>
    %c0_44 = arith.constant 0 : index
    %c0_45 = arith.constant 0 : index
    %152 = vector.load %arg9[%c0_44, %c0_45] : memref<1x32xf32, #tpu.memory_space<vmem>>, vector<1x32xf32>
    %153 = vector.broadcast %152 : vector<1x32xf32> to vector<8x32xf32>
    %154 = arith.addf %151, %153 : vector<8x32xf32>
    %155 = arith.addf %1, %154 : vector<8x32xf32>
    %c0_46 = arith.constant 0 : index
    %c0_47 = arith.constant 0 : index
    %156 = vector.load %arg10[%c0_46, %c0_47] : memref<1x32xf32, #tpu.memory_space<vmem>>, vector<1x32xf32>
    %c0_48 = arith.constant 0 : index
    %c0_49 = arith.constant 0 : index
    %157 = vector.load %arg11[%c0_48, %c0_49] : memref<1x32xf32, #tpu.memory_space<vmem>>, vector<1x32xf32>
    %cst_50 = arith.constant dense<0.000000e+00> : vector<8xf32>
    %158 = vector.multi_reduction <add>, %155, %cst_50 [1] : vector<8x32xf32> to vector<8xf32>
    %159 = vector.shape_cast %158 : vector<8xf32> to vector<8x1xf32>
    %cst_51 = arith.constant 3.200000e+01 : f32
    %160 = vector.broadcast %cst_51 : f32 to vector<8x1xf32>
    %161 = arith.divf %159, %160 : vector<8x1xf32>
    %162 = vector.broadcast %161 : vector<8x1xf32> to vector<8x32xf32>
    %163 = arith.subf %155, %162 : vector<8x32xf32>
    %164 = arith.mulf %163, %163 : vector<8x32xf32>
    %cst_52 = arith.constant dense<0.000000e+00> : vector<8xf32>
    %165 = vector.multi_reduction <add>, %164, %cst_52 [1] : vector<8x32xf32> to vector<8xf32>
    %166 = vector.shape_cast %165 : vector<8xf32> to vector<8x1xf32>
    %cst_53 = arith.constant 3.200000e+01 : f32
    %167 = vector.broadcast %cst_53 : f32 to vector<8x1xf32>
    %168 = arith.divf %166, %167 : vector<8x1xf32>
    %169 = vector.broadcast %161 : vector<8x1xf32> to vector<8x32xf32>
    %170 = arith.subf %155, %169 : vector<8x32xf32>
    %cst_54 = arith.constant 9.99999974E-6 : f32
    %171 = vector.broadcast %cst_54 : f32 to vector<8x1xf32>
    %172 = arith.addf %168, %171 : vector<8x1xf32>
    %173 = math.rsqrt %172 : vector<8x1xf32>
    %174 = vector.broadcast %173 : vector<8x1xf32> to vector<8x32xf32>
    %175 = arith.mulf %170, %174 : vector<8x32xf32>
    %176 = vector.broadcast %156 : vector<1x32xf32> to vector<8x32xf32>
    %177 = arith.mulf %175, %176 : vector<8x32xf32>
    %178 = vector.broadcast %157 : vector<1x32xf32> to vector<8x32xf32>
    %179 = arith.addf %177, %178 : vector<8x32xf32>
    %180 = arith.truncf %179 : vector<8x32xf32> to vector<8x32xbf16>
    %c0_55 = arith.constant 0 : index
    %c0_56 = arith.constant 0 : index
    %181 = vector.load %arg12[%c0_55, %c0_56] : memref<32x128xbf16, #tpu.memory_space<vmem>>, vector<32x128xbf16>
    %cst_57 = arith.constant dense<0.000000e+00> : vector<8x128xf32>
    %182 = tpu.matmul %180, %181, %cst_57 {dimension_numbers = #tpu.dot_dimension_numbers<[1], [0], [0], [1], [0, 0, 1, 1], [], []>} : vector<8x32xbf16>, vector<32x128xbf16>, vector<8x128xf32> -> vector<8x128xf32>
    %c0_58 = arith.constant 0 : index
    %c0_59 = arith.constant 0 : index
    %183 = vector.load %arg13[%c0_58, %c0_59] : memref<1x128xf32, #tpu.memory_space<vmem>>, vector<1x128xf32>
    %184 = vector.broadcast %183 : vector<1x128xf32> to vector<8x128xf32>
    %185 = arith.addf %182, %184 : vector<8x128xf32>
    %cst_60 = arith.constant 5.000000e-01 : f32
    %186 = vector.broadcast %cst_60 : f32 to vector<8x128xf32>
    %187 = arith.mulf %186, %185 : vector<8x128xf32>
    %cst_61 = arith.constant 0.707106769 : f32
    %188 = vector.broadcast %cst_61 : f32 to vector<8x128xf32>
    %189 = arith.mulf %185, %188 : vector<8x128xf32>
    %cst_62 = arith.constant 0.000000e+00 : f32
    %190 = vector.broadcast %cst_62 : f32 to vector<8x128xf32>
    %191 = arith.cmpf oge, %189, %190 : vector<8x128xf32>
    %cst_63 = arith.constant 1.000000e+00 : f32
    %cst_64 = arith.constant -1.000000e+00 : f32
    %192 = vector.broadcast %cst_63 : f32 to vector<8x128xf32>
    %193 = vector.broadcast %cst_64 : f32 to vector<8x128xf32>
    %194 = arith.select %191, %192, %193 : vector<8x128xi1>, vector<8x128xf32>
    %195 = math.absf %189 : vector<8x128xf32>
    %cst_65 = arith.constant 0.327591091 : f32
    %196 = vector.broadcast %cst_65 : f32 to vector<8x128xf32>
    %197 = arith.mulf %196, %195 : vector<8x128xf32>
    %cst_66 = arith.constant 1.000000e+00 : f32
    %198 = vector.broadcast %cst_66 : f32 to vector<8x128xf32>
    %199 = arith.addf %198, %197 : vector<8x128xf32>
    %200 = tpu.reciprocal %199 {approx = true} : vector<8x128xf32> -> vector<8x128xf32>
    %cst_67 = arith.constant 1.06140542 : f32
    %201 = vector.broadcast %cst_67 : f32 to vector<8x128xf32>
    %202 = arith.mulf %201, %200 : vector<8x128xf32>
    %cst_68 = arith.constant -1.45315206 : f32
    %203 = vector.broadcast %cst_68 : f32 to vector<8x128xf32>
    %204 = arith.addf %202, %203 : vector<8x128xf32>
    %205 = arith.mulf %204, %200 : vector<8x128xf32>
    %cst_69 = arith.constant 1.42141378 : f32
    %206 = vector.broadcast %cst_69 : f32 to vector<8x128xf32>
    %207 = arith.addf %205, %206 : vector<8x128xf32>
    %208 = arith.mulf %207, %200 : vector<8x128xf32>
    %cst_70 = arith.constant -0.284496725 : f32
    %209 = vector.broadcast %cst_70 : f32 to vector<8x128xf32>
    %210 = arith.addf %208, %209 : vector<8x128xf32>
    %211 = arith.mulf %210, %200 : vector<8x128xf32>
    %cst_71 = arith.constant 0.254829586 : f32
    %212 = vector.broadcast %cst_71 : f32 to vector<8x128xf32>
    %213 = arith.addf %211, %212 : vector<8x128xf32>
    %214 = arith.mulf %213, %200 : vector<8x128xf32>
    %cst_72 = arith.constant 0.000000e+00 : f32
    %215 = vector.broadcast %cst_72 : f32 to vector<8x128xf32>
    %216 = arith.subf %215, %195 : vector<8x128xf32>
    %217 = arith.mulf %216, %195 : vector<8x128xf32>
    %218 = math.exp %217 : vector<8x128xf32>
    %219 = arith.mulf %214, %218 : vector<8x128xf32>
    %cst_73 = arith.constant 1.000000e+00 : f32
    %220 = vector.broadcast %cst_73 : f32 to vector<8x128xf32>
    %221 = arith.subf %220, %219 : vector<8x128xf32>
    %222 = arith.mulf %194, %221 : vector<8x128xf32>
    %cst_74 = arith.constant 1.000000e+00 : f32
    %223 = vector.broadcast %cst_74 : f32 to vector<8x128xf32>
    %224 = arith.addf %223, %222 : vector<8x128xf32>
    %225 = arith.mulf %187, %224 : vector<8x128xf32>
    %226 = arith.truncf %225 : vector<8x128xf32> to vector<8x128xbf16>
    %c0_75 = arith.constant 0 : index
    %c0_76 = arith.constant 0 : index
    %227 = vector.load %arg14[%c0_75, %c0_76] : memref<128x32xbf16, #tpu.memory_space<vmem>>, vector<128x32xbf16>
    %cst_77 = arith.constant dense<0.000000e+00> : vector<8x32xf32>
    %228 = tpu.matmul %226, %227, %cst_77 {dimension_numbers = #tpu.dot_dimension_numbers<[1], [0], [0], [1], [0, 0, 1, 1], [], []>} : vector<8x128xbf16>, vector<128x32xbf16>, vector<8x32xf32> -> vector<8x32xf32>
    %c0_78 = arith.constant 0 : index
    %c0_79 = arith.constant 0 : index
    %229 = vector.load %arg15[%c0_78, %c0_79] : memref<1x32xf32, #tpu.memory_space<vmem>>, vector<1x32xf32>
    %230 = vector.broadcast %229 : vector<1x32xf32> to vector<8x32xf32>
    %231 = arith.addf %228, %230 : vector<8x32xf32>
    %232 = arith.addf %155, %231 : vector<8x32xf32>
    %c0_80 = arith.constant 0 : index
    %c0_81 = arith.constant 0 : index
    %c0_82 = arith.constant 0 : index
    %233 = vector.load %arg16[%c0_80, %c0_81, %c0_82] : memref<1x8x32xf32, #tpu.memory_space<vmem>>, vector<1x8x32xf32>
    %234 = vector.shape_cast %233 : vector<1x8x32xf32> to vector<8x32xf32>
    %235 = vector.shape_cast %232 : vector<8x32xf32> to vector<1x8x32xf32>
    tpu.vector_store %arg16[%c0_80, %c0_81, %c0_82], %235 {strides = array<i32>} : memref<1x8x32xf32, #tpu.memory_space<vmem>>, vector<1x8x32xf32>,
    return
  }
  func.func @transform_0(%arg0: i32) -> (i32, i32, i32) {
    %c0_i32 = arith.constant 0 : i32
    %c0_i32_0 = arith.constant 0 : i32
    %c0_i32_1 = arith.constant 0 : i32
    return %arg0, %c0_i32, %c0_i32_0 : i32, i32, i32
  }
  func.func @transform_1(%arg0: i32) -> (i32, i32) {
    %c0_i32 = arith.constant 0 : i32
    %c0_i32_0 = arith.constant 0 : i32
    %c0_i32_1 = arith.constant 0 : i32
    return %c0_i32, %c0_i32_0 : i32, i32
  }
  func.func @transform_2(%arg0: i32) -> (i32, i32) {
    %c0_i32 = arith.constant 0 : i32
    %c0_i32_0 = arith.constant 0 : i32
    %c0_i32_1 = arith.constant 0 : i32
    return %c0_i32, %c0_i32_0 : i32, i32
  }
  func.func @transform_3(%arg0: i32) -> (i32, i32) {
    %c0_i32 = arith.constant 0 : i32
    %c0_i32_0 = arith.constant 0 : i32
    %c0_i32_1 = arith.constant 0 : i32
    return %c0_i32, %c0_i32_0 : i32, i32
  }
  func.func @transform_4(%arg0: i32) -> (i32, i32) {
    %c0_i32 = arith.constant 0 : i32
    %c0_i32_0 = arith.constant 0 : i32
    %c0_i32_1 = arith.constant 0 : i32
    return %c0_i32, %c0_i32_0 : i32, i32
  }
  func.func @transform_5(%arg0: i32) -> (i32, i32) {
    %c0_i32 = arith.constant 0 : i32
    %c0_i32_0 = arith.constant 0 : i32
    %c0_i32_1 = arith.constant 0 : i32
    return %c0_i32, %c0_i32_0 : i32, i32
  }
  func.func @transform_6(%arg0: i32) -> (i32, i32) {
    %c0_i32 = arith.constant 0 : i32
    %c0_i32_0 = arith.constant 0 : i32
    %c0_i32_1 = arith.constant 0 : i32
    return %c0_i32, %c0_i32_0 : i32, i32
  }
  func.func @transform_7(%arg0: i32) -> (i32, i32) {
    %c0_i32 = arith.constant 0 : i32
    %c0_i32_0 = arith.constant 0 : i32
    %c0_i32_1 = arith.constant 0 : i32
    return %c0_i32, %c0_i32_0 : i32, i32
  }
  func.func @transform_8(%arg0: i32) -> (i32, i32) {
    %c0_i32 = arith.constant 0 : i32
    %c0_i32_0 = arith.constant 0 : i32
    %c0_i32_1 = arith.constant 0 : i32
    return %c0_i32, %c0_i32_0 : i32, i32
  }
  func.func @transform_9(%arg0: i32) -> (i32, i32) {
    %c0_i32 = arith.constant 0 : i32
    %c0_i32_0 = arith.constant 0 : i32
    %c0_i32_1 = arith.constant 0 : i32
    return %c0_i32, %c0_i32_0 : i32, i32
  }
  func.func @transform_10(%arg0: i32) -> (i32, i32) {
    %c0_i32 = arith.constant 0 : i32
    %c0_i32_0 = arith.constant 0 : i32
    %c0_i32_1 = arith.constant 0 : i32
    return %c0_i32, %c0_i32_0 : i32, i32
  }
  func.func @transform_11(%arg0: i32) -> (i32, i32) {
    %c0_i32 = arith.constant 0 : i32
    %c0_i32_0 = arith.constant 0 : i32
    %c0_i32_1 = arith.constant 0 : i32
    return %c0_i32, %c0_i32_0 : i32, i32
  }
  func.func @transform_12(%arg0: i32) -> (i32, i32) {
    %c0_i32 = arith.constant 0 : i32
    %c0_i32_0 = arith.constant 0 : i32
    %c0_i32_1 = arith.constant 0 : i32
    return %c0_i32, %c0_i32_0 : i32, i32
  }
  func.func @transform_13(%arg0: i32) -> (i32, i32) {
    %c0_i32 = arith.constant 0 : i32
    %c0_i32_0 = arith.constant 0 : i32
    %c0_i32_1 = arith.constant 0 : i32
    return %c0_i32, %c0_i32_0 : i32, i32
  }
  func.func @transform_14(%arg0: i32) -> (i32, i32) {
    %c0_i32 = arith.constant 0 : i32
    %c0_i32_0 = arith.constant 0 : i32
    %c0_i32_1 = arith.constant 0 : i32
    return %c0_i32, %c0_i32_0 : i32, i32
  }
  func.func @transform_15(%arg0: i32) -> (i32, i32, i32) {
    %c0_i32 = arith.constant 0 : i32
    %c0_i32_0 = arith.constant 0 : i32
    %c0_i32_1 = arith.constant 0 : i32
    return %arg0, %c0_i32, %c0_i32_0 : i32, i32, i32
  }
}

</mosaic_0001>

<bundles_post_ra>
// kernel: tpu_custom_call.1
= control target key start
LH: loop header
LB: loop body
LE: loop exit
PB: predicated region body
PF: predicated region fallthrough
CT: control target
= control target key end

     0   :  { %s2023_s0 = inlined_call_operand.hbm [shape: f32[2,8,32], index: 0, kind: input, shape index: {}, may-alias: {0,15}]   ;;  %s2024_s1 = inlined_call_operand.vmem [shape: f32[1,32], index: 1, kind: input, shape index: {}]   ;;  %s2025_s2 = inlined_call_operand.vmem [shape: f32[1,32], index: 2, kind: input, shape index: {}]   ;;  %s2026_s3 = inlined_call_operand.vmem [shape: bf16[32,96], index: 3, kind: input, shape index: {}]   ;;  %s2027_s4 = inlined_call_operand.vmem [shape: f32[1,96], index: 4, kind: input, shape index: {}]   ;;  %s2028_s5 = inlined_call_operand.vmem [shape: f32[8,16], index: 5, kind: input, shape index: {}]   ;;  %s2029_s6 = inlined_call_operand.vmem [shape: f32[8,16], index: 6, kind: input, shape index: {}]   ;;  %s2030_s7 = inlined_call_operand.vmem [shape: bf16[32,32], index: 7, kind: input, shape index: {}]   ;;  %s2031_s8 = inlined_call_operand.vmem [shape: f32[1,32], index: 8, kind: input, shape index: {}]   ;;  %s2032_s9 = inlined_call_operand.vmem [shape: f32[1,32], index: 9, kind: input, shape index: {}]   ;;  %s2033_s10 = inlined_call_operand.vmem [shape: f32[1,32], index: 10, kind: input, shape index: {}]   ;;  %s2034_s11 = inlined_call_operand.vmem [shape: bf16[32,128], index: 11, kind: input, shape index: {}]   ;;  %s2035_s12 = inlined_call_operand.vmem [shape: f32[1,128], index: 12, kind: input, shape index: {}]   ;;  %s2036_s13 = inlined_call_operand.vmem [shape: bf16[128,32], index: 13, kind: input, shape index: {}]   ;;  %s2037_s14 = inlined_call_operand.vmem [shape: f32[1,32], index: 14, kind: input, shape index: {}]   ;;  %s2038_s15 = inlined_call_operand.hbm [shape: f32[2,8,32], index: 15, kind: output, shape index: {}, may-alias: {0,15}]  }
   0x1   :  { %2048 = sst [smem:[#allocation15_spill]] %s2037_s14 }
   0x2   :  { %2049 = sst [smem:[#allocation16_spill]] %s2038_s15 }
   0x3   :  { %20 = vsyncpa [#allocation3], 0 }
   0x4   :  { %22 = vsyncpa [#allocation3 + $0x1], 0 }
   0x5   :  { %23 = vsyncpa [#allocation4], 0 }
   0x6   :  { %25 = vsyncpa [#allocation4 + $0x1], 0  ;;  %s1715_s18 = smov 0   ;;  %s1717_s19 = smov 0  }
   0x7   :  { %s1719_s20 = smov 0   ;;  %s1721_s21 = smov 0  }
   0x8 LB: > { %2050 = sst [smem:[#allocation8_spill]] %s1595_s18  ;;  %s1736_s22 = sadd.s32 4294967295, %s1607_s21   ;;  %s1607_s21 = sphi %s1721_s21, %s2069_s21   ;;  %s1603_s20 = sphi %s1719_s20, %s2071_s20   ;;  %s1599_s19 = sphi %s1717_s19, %s2073_s19   ;;  %s1595_s18 = sphi %s1715_s18, %s2072_s18  }
   0x9   : > { %2051 = sst [smem:[#allocation9_spill]] %s1603_s20  ;;  %s1308_s23 = sadd.s32 4294967294, %s1607_s21  }
   0xa   : > { %2052 = sst [smem:[#allocation10_spill]] %s1736_s22  ;;  %s1740_s24 = sadd.s32 1, %s1607_s21  }
   0xb   : > { %2053 = sst [smem:[#allocation11_spill]] %s1740_s24  ;;  %s38_s25 = sadd.s32 1, %s1603_s20 }
   0xc   : > { %s35_s26 = ssub.s32 %s1607_s21, %s1740_s24  ;;  %p45_p0 = scmp.ne.s32.totalorder %s1603_s20, %s1599_s19 }
   0xd   : > { %p36_p1 = scmp.eq.s32.totalorder %s35_s26, 0  ;;  %p46_p2 = scmp.eq.s32.totalorder %s1607_s21, 0 }
   0xe   : > { %p51_p3 = scmp.ne.s32.totalorder %s1599_s19, %s1595_s18  ;;  %p52_p4 = scmp.eq.s32.totalorder %s1736_s22, 0 }
   0xf   : > { %s1752_s27 = scalar_select %p36_p1, %s1603_s20, %s38_s25  }
  0x10   : > { %p1754_p5 = por %p46_p2, %p45_p0  ;;  %p1758_p6 = por %p52_p4, %p51_p3 }
  0x11   : > { %2054 = sst [smem:[#allocation12_spill]] %s1752_s27  ;;  %p369_p7 = scmp.eq.s32.totalorder %s1736_s22, 1 }
  0x12   : > { %p375_p8 = scmp.eq.s32.totalorder %s1308_s23, 1  ;;  %p1417_p10 = scmp.lt.s32.totalorder %s1607_s21, 2 }
  0x13   : > { %p1765_p11 = por %p369_p7, %p45_p0  ;;  %s437_s17 = sand.u32 1, %s1603_s20  }
  0x14   : > { %p1769_p12 = por %p375_p8, %p51_p3  ;;  %s1312_s25 = sshll.u32 %s1607_s21, 3 }
  0x15   : > { %s2057_s30 = scalar_select %p1765_p11, 1, 0 }
  0x16   : > { %s2059_s16 = scalar_select %p1769_p12, 1, 0 }
  0x17   : > { %2058 = sst [smem:[#allocation13_spill]] %s2057_s30  ;;  %s1311_s26 = sshll.u32 %s437_s17, 3 }
  0x18   : > { %2060 = sst [smem:[#allocation14_spill]] %s2059_s16  ;;  %s445_s18 = scalar_lea.hbm %s2023_s0, %s1312_s25 }
  0x19   : > { %s447_s15 = sshll.u32 %s445_s18, 4  ;;  %s441_s23 = scalar_lea.vmem [#allocation2], %s1311_s26  ;;  %s448_s15 = int_to_ptr.hbm [resolvable:$true] %s447_s15 }
  0x1a   : > { %s449_s14 = sshll.u32 %s441_s23, 4  ;;  %p1780_p13 = pnand %p1417_p10, %p1754_p5  ;;  %s450_s14 = int_to_ptr.vmem [resolvable:$true] %s449_s14 }
  0x1b   : > { %p1313_p0 = scmp.ge.s32.totalorder %s1607_s21, 1  ;;  %p454_p1 = scmp.lt.s32.totalorder %s1607_s21, 3 }
  0x1c   : > { %s438_s20 = scalar_lea.sflag [#allocation3], %s437_s17  ;;  %s1511_s16 = sshra.s32 %s448_s15, 4  ;;  %s1512_s16 = int_to_ptr.hbm [resolvable:$true] %s1511_s16 }
  0x1d   : > { %s1513_s30 = scalar_lea.hbm %s1512_s16, 8  ;;  %p1515_p3 = pneg %p1780_p13 }
  0x1e   : > { %p1514_p2 = scmp.ne.s32.totalorder %s1512_s16, %s1513_s30  ;;  %s1518_s27 = scalar_lea.hbm %s2023_s0, 16 }
  0x1f   : > { %p1519_p5 = scmp.lt.s32.totalorder %s1512_s16, %s2023_s0  ;;  %p1520_p8 = scmp.lt.s32.totalorder %s1518_s27, %s1513_s30 }
  0x20   : > { %p1516_p4 = pnand %p1515_p3, %p1514_p2 }
  0x21   : > { %p1521_p10 = por %p1520_p8, %p1519_p5 }
  0x22   : > { %p1517_p7 = pneg %p1516_p4 }
  0x24   : > { %p1522_p9 = pnand %p1521_p10, %p1517_p7 }
  0x26   : > { %1525 = shalt.err (!%p1522_p9)
}
  0x27   : > { %1412 = dma.hbm_to_vmem [thread:$0]  (!%p1780_p13), %s448_s15, 128, %s450_s14, %s438_s20  }
  0x28   : > { %p455_p2 = pnand %p1313_p0, %p454_p1 }
  0x29   : > { %s1801_s17 = sand.u32 (!%p455_p2), 1, %s1599_s19  }
  0x2a   : > { %458 = sbr.rel (%p455_p2) target bundleno = 2480 (0x9b0), region = 80  ;;  %s1314_s30 = sshll.u32 (!%p455_p2), %s1801_s17, 3 }
  0x2b   : > { %s461_s16 = scalar_lea.sflag (!%p455_p2), [#allocation3], %s1801_s17  ;;  %s464_s26 = scalar_lea.vmem (!%p455_p2), [#allocation2], %s1314_s30 }
  0x2f   : > { %1586 = dma.done.wait (%p1758_p6), %s461_s16, 128  }
  0x30   : > { %1588 = vsyncadd (%p1758_p6), %s461_s16, 4294967168  ;;  %vm516_vm0 = vcmask 261120   ;;  %v1811_v0 = vld [vmem:[%s464_s26] sm:$0xff]  ;;  %v1609_v2 = vmov 32.0   ;;  %s1610_s27 = smov 48   ;;  %s1611_s28 = smov 32  }
  0x31   : > { %v517_v1 = vsel %vm516_vm0, %v1811_v0, 0.0  ;;  %1485 = vrcp.f32 %v1609_v2  ;;  %v1392_v14 = vld [vmem:[%s2026_s3 + $0x8] sm:$0xff]  ;;  %v1391_v15 = vld [vmem:[%s2026_s3] sm:$0xff]  ;;  %s1612_s22 = smov 16   ;;  %s1613_s29 = smov 112   ;;  %vm662_vm5 = vcmask 31744  }
  0x32   : > { %518 = vadd.xlane.f32.xlu0 %v517_v1  ;;  %584 = vmatpush.bf16.msra.mxu0 %v1392_v14  ;;  %v592_v16 = vld [vmem:[%s2029_s6] sm:$0xff]  ;;  %s1614_s23 = smov 96   ;;  %s1615_s18 = smov 80   ;;  %vm726_vm6 = vcmask 1043456   ;;  %vm707_vm8 = vcmask 64512   ;;  %vm1001_vm9 = vcmask 130048  }
  0x33   : > { %v1832_v17 = vld [vmem:[%s2028_s5] sm:$0xff]  ;;  %621 = vrot.lane.b32.xlu1 %v592_v16, %s1610_s27  ;;  %s1616_s24 = smov 64   ;;  %s1618_s25 = smov 76   ;;  %vm1003_vm10 = vcmask 195584  }
  0x34   : > { %617 = vrot.lane.b32.xlu2 %v1832_v17, %s1611_s28  ;;  %v1477_v27 = vld [vmem:[%s2024_s1] ss:$0 sm:$0xff]  ;;  %s1619_s16 = smov 108   ;;  %s1620_s26 = smov 124  }
  0x35   : > { %v1478_v30 = vld [vmem:[%s2025_s2] ss:$0 sm:$0xff]  ;;  %s1621_s14 = smov 72   ;;  %s1622_s15 = smov 56  }
  0x36   : > { %585 = vmatpush.bf16.msra.mxu0 %v1391_v15  ;;  %v1479_v35 = vld [vmem:[%s2027_s4] ss:$0 sm:$0xff]  ;;  %s1623_s20 = smov 84  }
  0x37   : > { %v1486_v3 = vpop.eup %1485 }
  0x38   : > { %v521_v4 = vmul.f32 32.0, %v1486_v3  ;;  %vm525_vm1 = vweird.f32 %v1486_v3 }
  0x3a   : > { %v522_v5 = vsub.f32 1.0, %v521_v4 }
  0x3b   : > { %635 = vrot.lane.b32.xlu1 %v592_v16, %s1611_s28  ;;  %s1617_s28 = smov 92  }
  0x3c   : > { %v523_v6 = vmul.f32 %v1486_v3, %v522_v5 }
  0x3e   : > { %v524_v7 = vadd.f32 %v1486_v3, %v523_v6 }
  0x40   : > { %v1815_v8 = vsel %vm525_vm1, %v1486_v3, %v524_v7 }
  0x8e   : > { %v618_v43 = vpop.permute.xlu2 %617 }
  0xa5   : > { %v519_v9 = vpop.xlane.xlu0 %518  ;;  %v622_v34 = vpop.permute.xlu1 %621 }
  0xa6   : > { %v527_v10 = vmul.f32 %v1815_v8, %v519_v9 }
  0xa8   : > { %v528_v11 = vsub.f32 %v1811_v0, %v527_v10 }
  0xaa   : > { %v529_v12 = vmul.f32 %v528_v11, %v528_v11 }
  0xac   : > { %v530_v13 = vsel %vm516_vm0, %v529_v12, 0.0 }
  0xad   : > { %531 = vadd.xlane.f32.xlu0 %v530_v13  ;;  %v636_v37 = vpop.permute.xlu1 %635 }
  0xc1   : > { %631 = vrot.lane.b32.xlu0 %v1832_v17, %s1610_s27 }
 0x120   : > { %v532_v18 = vpop.xlane.xlu0 %531 }
 0x121   : > { %v533_v19 = vmul.f32 %v532_v18, %v1815_v8 }
 0x123   : > { %v534_v20 = vadd.f32 1e-05, %v533_v19 }
 0x125   : > { %1487 = vrsqrt.f32 %v534_v20  ;;  %vm541_vm3 = vweird.f32 %v534_v20 }
 0x12b   : > { %v1488_v21 = vpop.eup %1487 }
 0x12c   : > { %v536_v22 = vmul.f32 %v1488_v21, %v534_v20  ;;  %vm542_vm2 = vweird.f32 %v1488_v21 }
 0x12d   : > { %vm543_vm4 = vmor %vm541_vm3, %vm542_vm2 }
 0x12e   : > { %v537_v23 = vmul.f32 %v1488_v21, %v536_v22 }
 0x130   : > { %v538_v24 = vmul.f32 0.5, %v537_v23 }
 0x132   : > { %v539_v25 = vsub.f32 1.5, %v538_v24 }
 0x133   : > { %v632_v52 = vpop.permute.xlu0 %631 }
 0x134   : > { %v540_v26 = vmul.f32 %v1488_v21, %v539_v25 }
 0x136   : > { %v544_v28 = vsel %vm543_vm4, %v1488_v21, %v540_v26 }
 0x137   : > { %v545_v29 = vmul.f32 %v544_v28, %v528_v11 }
 0x139   : > { %v549_v31 = vmul.f32 %v1477_v27, %v545_v29 }
 0x13b   : > { %v553_v32 = vadd.f32 %v1478_v30, %v549_v31 }
 0x13d   : > { %v554_v33 = vpack.c.bf16 %v553_v32, %v553_v32 }
 0x13f   : > { %1324 = vmatmul.msk.bf16.vlgmr.msra.gmra.mxu0 %vm516_vm0, %v554_v33 }
 0x1bc   : > { %v587_v36 = vpop.f32.mrf.mxu0 }
 0x1bd   : > { %v588_v38 = vadd.f32 %v1479_v35, %v587_v36  ;;  %v646_v35 = vlaneseq }
 0x1bf   : > { %v638_v39 = vmul.f32 %v636_v37, %v588_v38  ;;  %v624_v40 = vmul.f32 %v622_v34, %v588_v38  ;;  %v610_v42 = vmul.f32 %v592_v16, %v588_v38  ;;  %v620_v44 = vmul.f32 %v618_v43, %v588_v38 }
 0x1c0   : > { %v634_v53 = vmul.f32 %v632_v52, %v588_v38  ;;  %v645_v59 = vpack.c.bf16 %v588_v38, %v588_v38  ;;  %v593_v6 = vmul.f32 %v1832_v17, %v588_v38  ;;  %v647_v36 = vshrl.u32 %v646_v35, 7 }
 0x1c1   : > { %640 = vrot.lane.b32.xlu1 %v638_v39, %s1612_s22  ;;  %626 = vrot.lane.b32.xlu2 %v624_v40, %s1613_s29  ;;  %v649_v37 = vand.u32 127, %v646_v35  ;;  %v1627_v39 = vmov -1e+30  }
 0x1c2   : > { %v719_v1 = vunpack.c.l.b16 %v645_v59 }
 0x1c3   : > { %vm650_vm7 = vcmp.le.s32.totalorder %v649_v37, %v647_v36 }
 0x1c4   : > { %v589_v41 = vpop.f32.mrf.mxu0  ;;  %v1856_v4 = vpack.c.b16 %v719_v1, %v719_v1  ;;  %v1881_v40 = vsel %vm650_vm7, 0.0, %v1627_v39 }
 0x1c9   : > { %606 = vrot.lane.b32.xlu1 %v1832_v17, %s1612_s22  ;;  %595 = vrot.lane.b32.xlu2 %v592_v16, %s1612_s22 }
 0x1d1   : > { %612 = vrot.lane.b32.xlu2 %v610_v42, %s1612_s22 }
 0x21b   : > { %v627_v45 = vpop.permute.xlu2 %626 }
 0x21c   : > { %v629_v46 = vsub.f32 %v620_v44, %v627_v45 }
 0x21e   : > { %v630_v47 = vpack.c.bf16 %v629_v46, %v629_v46 }
 0x220   : > { %v683_v48 = vunpack.c.l.b16 %v630_v47 }
 0x222   : > { %v684_v49 = vpack.c.b16 %v683_v48, %v683_v48 }
 0x223   : > { %v596_v50 = vpop.permute.xlu2 %595 }
 0x224   : > { %v598_v51 = vmul.f32 %v596_v50, %v588_v38  ;;  %685 = vrot.lane.b32.xlu1 %v684_v49, %s1614_s23  ;;  %s1625_s23 = smov 68  }
 0x226   : > { %600 = vrot.lane.b32.xlu2 %v598_v51, %s1613_s29 }
 0x22b   : > { %v613_v62 = vpop.permute.xlu2 %612 }
 0x233   : > { %v641_v54 = vpop.permute.xlu1 %640 }
 0x234   : > { %v643_v55 = vadd.f32 %v641_v54, %v634_v53 }
 0x236   : > { %v644_v56 = vpack.c.bf16 %v643_v55, %v643_v55 }
 0x238   : > { %v658_v57 = vunpack.c.l.b16 %v644_v56 }
 0x23a   : > { %v659_v58 = vpack.c.b16 %v658_v57, %v658_v57 }
 0x23b   : > { %v607_v60 = vpop.permute.xlu1 %606 }
 0x23c   : > { %v609_v61 = vmul.f32 %v607_v60, %v588_v38  ;;  %660 = vrot.lane.b32.xlu0 %v659_v58, %s1615_s18  ;;  %s1626_s18 = smov 100  }
 0x23e   : > { %v615_v63 = vadd.f32 %v613_v62, %v609_v61 }
 0x240   : > { %v616_v2 = vpack.c.bf16 %v615_v63, %v615_v63 }
 0x242   : > { %v653_v3 = vunpack.c.l.b16 %v616_v2 }
 0x244   : > { %v1858_v5 = vpack.c.b16 %v653_v3, %v653_v3  ;;  %721 = vrot.lane.b32.xlu0 %v1856_v4, %s1616_s24  ;;  %s1628_s24 = smov 104  }
 0x246   : > { %655 = vrot.lane.b32.xlu1 %v1858_v5, %s1613_s29  ;;  %s1624_s29 = smov 88  }
 0x24c   : > { %773 = vrot.lane.b32.xlu0 %v684_v49, %s1617_s28  ;;  %s1629_s28 = smov 116  }
 0x24e   : > { %747 = vrot.lane.b32.xlu1 %v659_v58, %s1618_s25  ;;  %s1630_s25 = smov 120  }
 0x256   : > { %745 = vrot.lane.b32.xlu1 %v1858_v5, %s1619_s16  ;;  %s1631_s16 = smov 40  }
 0x280   : > { %v601_v7 = vpop.permute.xlu2 %600 }
 0x281   : > { %v603_v9 = vsub.f32 %v593_v6, %v601_v7 }
 0x283   : > { %v604_v10 = vpack.c.bf16 %v603_v9, %v603_v9 }
 0x285   : > { %v769_v11 = vunpack.c.l.b16 %v604_v10 }
 0x287   : > { %v1865_v12 = vpack.c.b16 %v769_v11, %v769_v11 }
 0x289   : > { %771 = vrot.lane.b32.xlu0 %v1865_v12, %s1620_s26  ;;  %s1633_s26 = smov 24  }
 0x291   : > { %830 = vrot.lane.b32.xlu0 %v659_v58, %s1621_s14  ;;  %s2064_s14 = sld [smem:[#allocation16_spill]] }
 0x296   : > { %v686_v13 = vpop.permute.xlu1 %685 }
 0x297   : > { %v691_v14 = vsel %vm662_vm5, %v686_v13, 0 }
 0x298   : > { %700 = vmatpush.bf16.xpose.msra.mxu2 %v691_v14 }
 0x299   : > { %805 = vrot.lane.b32.xlu0 %v1856_v4, %s1622_s15 }
 0x29f   : > { %1326 = vmatmul.msk.bf16.vlgmr.msra.gmra.mxu2 %vm662_vm5, %v604_v10 }
 0x2a1   : > { %933 = vrot.lane.b32.xlu0 %v684_v49, %s1623_s20 }
 0x2a9   : > { %853 = vrot.lane.b32.xlu0 %v684_v49, %s1624_s29  ;;  %s511_s29 = scalar_lea.vmem [#allocation5], %s1314_s30  ;;  %s1561_s30 = scalar_lea.hbm %s2064_s14, 16 }
 0x2ae   : > { %v661_v15 = vpop.permute.xlu0 %660 }
 0x2af   : > { %v667_v16 = vsel %vm662_vm5, %v661_v15, 0 }
 0x2b0   : > { %676 = vmatpush.bf16.xpose.msra.mxu1 %v667_v16 }
 0x2b1   : > { %910 = vrot.lane.b32.xlu0 %v659_v58, %s1625_s23 }
 0x2b6   : > { %v722_v17 = vpop.permute.xlu0 %721 }
 0x2b7   : > { %v728_v18 = vsel %vm726_vm6, %v722_v17, 0 }
 0x2b8   : > { %v656_v19 = vpop.permute.xlu1 %655  ;;  %737 = vmatpush.bf16.msra.mxu3 %v728_v18 }
 0x2b9   : > { %908 = vrot.lane.b32.xlu0 %v1858_v5, %s1626_s18  ;;  %1325 = vmatmul.msk.bf16.vlgmr.msra.gmra.mxu1 %vm662_vm5, %v656_v19  ;;  %s2062_s18 = sld [smem:[#allocation10_spill]] }
 0x2be   : > { %v774_v20 = vpop.permute.xlu0 %773 }
 0x2bf   : > { %v779_v21 = vsel %vm662_vm5, %v774_v20, 0 }
 0x2c0   : > { %v748_v22 = vpop.permute.xlu1 %747  ;;  %788 = vmatpush.bf16.xpose.msrb.mxu0 %v779_v21 }
 0x2c1   : > { %v753_v23 = vsel %vm662_vm5, %v748_v22, 0 }
 0x2c2   : > { %762 = vmatpush.bf16.xpose.msrb.mxu3 %v753_v23 }
 0x2c8   : > { %v746_v55 = vpop.permute.xlu1 %745 }
 0x2fb   : > { %v772_v24 = vpop.permute.xlu0 %771 }
 0x2fc   : > { %1329 = vmatmul.msk.bf16.vlgmr.msrb.gmra.mxu0 %vm662_vm5, %v772_v24 }
 0x303   : > { %v831_v25 = vpop.permute.xlu0 %830 }
 0x304   : > { %v836_v53 = vsel %vm662_vm5, %v831_v25, 0 }
 0x30b   : > { %v806_v26 = vpop.permute.xlu0 %805 }
 0x30c   : > { %v811_v27 = vsel %vm726_vm6, %v806_v26, 0 }
 0x30d   : > { %820 = vmatpush.bf16.msrb.mxu1 %v811_v27 }
 0x313   : > { %v934_v28 = vpop.permute.xlu0 %933 }
 0x314   : > { %v939_v29 = vsel %vm662_vm5, %v934_v28, 0 }
 0x315   : > { %948 = vmatpush.bf16.xpose.msrb.mxu2 %v939_v29 }
 0x31b   : > { %v854_v30 = vpop.permute.xlu0 %853 }
 0x31c   : > { %v859_v56 = vsel %vm662_vm5, %v854_v30, 0 }
 0x322   : > { %v702_v31 = vpop.f32.mrf.mxu2 }
 0x323   : > { %v911_v32 = vpop.permute.xlu0 %910 }
 0x324   : > { %v916_v33 = vsel %vm662_vm5, %v911_v32, 0 }
 0x325   : > { %925 = vmatpush.bf16.xpose.msra.mxu1 %v916_v33 }
 0x32a   : > { %v704_v34 = vpop.f32.mrf.mxu2 }
 0x336   : > { %v678_v38 = vpop.f32.mrf.mxu1 }
 0x337   : > { %v703_v41 = vadd.f32 %v702_v31, %v678_v38 }
 0x339   : > { %v706_v42 = vadd.f32 %v703_v41, %v1881_v40 }
 0x33b   : > { %v708_v43 = vsel %vm707_vm8, %v706_v42, -inf }
 0x33c   : > { %709 = vmax.xlane.f32.xlu2 %v708_v43 }
 0x33e   : > { %v680_v44 = vpop.f32.mrf.mxu1 }
 0x354   : > { %828 = vrot.lane.b32.xlu2 %v1858_v5, %s1628_s24  ;;  %s1388_s24 = sshll.u32 %s2062_s18, 3  ;;  %s1223_s18 = scalar_lea.sflag [#allocation4], %s1801_s17 }
 0x355   : > { %s1233_s20 = scalar_lea.hbm %s2064_s14, %s1388_s24 }
 0x356   : > { %s1237_s23 = sshll.u32 %s1233_s20, 4  ;;  %s1238_s23 = int_to_ptr.hbm [resolvable:$true] %s1237_s23 }
 0x35c   : > { %931 = vrot.lane.b32.xlu2 %v1865_v12, %s1629_s28  ;;  %s1555_s28 = sshra.s32 %s1238_s23, 4  ;;  %s1556_s28 = int_to_ptr.hbm [resolvable:$true] %s1555_s28 }
 0x35d   : > { %p1562_p0 = scmp.lt.s32.totalorder %s1556_s28, %s2064_s14 }
 0x379   : > { %v790_v45 = vpop.f32.mrf.mxu0 }
 0x381   : > { %v792_v46 = vpop.f32.mrf.mxu0 }
 0x3af   : > { %v710_v47 = vpop.xlane.xlu2 %709 }
 0x3b0   : > { %v711_v48 = vsub.f32 %v706_v42, %v710_v47 }
 0x3b2   : > { %v712_v49 = vmul.f32 1.442695, %v711_v48 }
 0x3b4   : > { %1489 = vpow2.f32 %v712_v49 }
 0x3b7   : > { %v829_v50 = vpop.permute.xlu2 %828 }
 0x3ba   : > { %v1887_v51 = vpop.eup %1489 }
 0x3bb   : > { %v717_v52 = vpack.c.bf16 %v1887_v51, %v1887_v51  ;;  %v714_v43 = vsel %vm707_vm8, %v1887_v51, 0.0 }
 0x3bd   : > { %1327 = vmatmul.msk.bf16.vlgmr.msra.gmra.mxu3 %vm707_vm8, %v717_v52 }
 0x3be   : > { %845 = vmatpush.bf16.xpose.msra.mxu3 %v836_v53 }
 0x3bf   : > { %v932_v54 = vpop.permute.xlu2 %931 }
 0x3c0   : > { %1335 = vmatmul.msk.bf16.vlgmr.msrb.gmra.mxu2 %vm662_vm5, %v932_v54 }
 0x3cd   : > { %1328 = vmatmul.msk.bf16.vlgmr.msrb.gmra.mxu3 %vm662_vm5, %v746_v55 }
 0x3ce   : > { %868 = vmatpush.bf16.xpose.msrb.mxu3 %v859_v56  ;;  %v1394_v56 = vld [vmem:[%s2030_s7 + $0x8] sm:$0xff] }
 0x3dd   : > { %1331 = vmatmul.msk.bf16.vlgmr.msra.gmra.mxu3 %vm662_vm5, %v829_v50 }
 0x440   : > { %v1897_v57 = vpop.f32.mrf.mxu3 }
 0x443   : > { %v950_v58 = vpop.f32.mrf.mxu2 }
 0x448   : > { %v741_v59 = vpop.f32.mrf.mxu3 }
 0x44b   : > { %v952_v60 = vpop.f32.mrf.mxu2 }
 0x450   : > { %v764_v61 = vpop.f32.mrf.mxu3 }
 0x451   : > { %v791_v62 = vadd.f32 %v790_v45, %v764_v61 }
 0x453   : > { %v794_v63 = vadd.f32 %v791_v62, %v1881_v40 }
 0x455   : > { %v795_v1 = vsel %vm707_vm8, %v794_v63, -inf }
 0x456   : > { %796 = vmax.xlane.f32.xlu1 %v795_v1 }
 0x458   : > { %v766_v2 = vpop.f32.mrf.mxu3 }
 0x460   : > { %v847_v3 = vpop.f32.mrf.mxu3 }
 0x468   : > { %v849_v5 = vpop.f32.mrf.mxu3 }
 0x46f   : > { %851 = vrot.lane.b32.xlu1 %v1865_v12, %s1630_s25  ;;  %v909_v12 = vpop.permute.xlu0 %908  ;;  %s1557_s25 = scalar_lea.hbm %s1556_s28, 8 }
 0x470   : > { %p1558_p6 = scmp.ne.s32.totalorder %s1556_s28, %s1557_s25  ;;  %p1563_p1 = scmp.lt.s32.totalorder %s1561_s30, %s1557_s25 }
 0x472   : > { %p1559_p9 = pnand %p1558_p6, %p1765_p11  ;;  %p1564_p3 = por %p1563_p1, %p1562_p0 }
 0x474   : > { %p1560_p13 = pneg %p1559_p9 }
 0x476   : > { %p1565_p4 = pnand %p1564_p3, %p1560_p13 }
 0x477   : > { %965 = vrot.lane.b32.xlu1 %v1856_v4, %s1631_s16  ;;  %s2063_s16 = sld [smem:[#allocation15_spill]] }
 0x47f   : > { %885 = vrot.lane.b32.xlu1 %v1856_v4, %s1610_s27  ;;  %s1632_s27 = smov 8  }
 0x4c9   : > { %v797_v6 = vpop.xlane.xlu1 %796 }
 0x4ca   : > { %v798_v7 = vsub.f32 %v794_v63, %v797_v6 }
 0x4cc   : > { %v799_v9 = vmul.f32 1.442695, %v798_v7  ;;  %v1480_v7 = vld [vmem:[%s2031_s8] ss:$0 sm:$0xff] }
 0x4ce   : > { %1491 = vpow2.f32 %v799_v9 }
 0x4d4   : > { %v1492_v10 = vpop.eup %1491 }
 0x4d5   : > { %v801_v11 = vsel %vm707_vm8, %v1492_v10, 0.0  ;;  %v804_v13 = vpack.c.bf16 %v1492_v10, %v1492_v10 }
 0x4d6   : > { %802 = vadd.xlane.f32.xlu1 %v801_v11 }
 0x4d7   : > { %1330 = vmatmul.msk.bf16.vlgmr.msrb.gmra.mxu1 %vm707_vm8, %v804_v13 }
 0x4e1   : > { %v852_v14 = vpop.permute.xlu1 %851 }
 0x4e2   : > { %1332 = vmatmul.msk.bf16.vlgmr.msrb.gmra.mxu3 %vm662_vm5, %v852_v14 }
 0x4e7   : > { %1334 = vmatmul.msk.bf16.vlgmr.msra.gmra.mxu1 %vm662_vm5, %v909_v12 }
 0x4e9   : > { %v966_v15 = vpop.permute.xlu1 %965 }
 0x4ea   : > { %v971_v4 = vsel %vm726_vm6, %v966_v15, 0 }
 0x4eb   : > { %980 = vmatpush.bf16.msra.mxu3 %v971_v4 }
 0x4f1   : > { %v886_v16 = vpop.permute.xlu1 %885 }
 0x4f2   : > { %v891_v17 = vsel %vm726_vm6, %v886_v16, 0 }
 0x4f3   : > { %900 = vmatpush.bf16.msra.mxu0 %v891_v17  ;;  %v1396_v17 = vld [vmem:[%s2034_s11 + $0x8] sm:$0xff] }
 0x4f4   : > { %1105 = vmatpush.bf16.msrb.mxu1 %v1396_v17 }
 0x4f7   : > { %1035 = vmatpush.bf16.msrb.mxu0 %v1394_v56 }
 0x549   : > { %v803_v42 = vpop.xlane.xlu1 %802 }
 0x554   : > { %v822_v18 = vpop.f32.mrf.mxu1 }
 0x55c   : > { %v824_v19 = vpop.f32.mrf.mxu1 }
 0x564   : > { %v927_v20 = vpop.f32.mrf.mxu1 }
 0x565   : > { %v951_v21 = vadd.f32 %v950_v58, %v927_v20  ;;  %v870_v22 = vpop.f32.mrf.mxu3  ;;  %v1393_v58 = vld [vmem:[%s2030_s7] sm:$0xff] }
 0x566   : > { %v871_v23 = vadd.f32 %v870_v22, %v847_v3  ;;  %1036 = vmatpush.bf16.msrb.mxu0 %v1393_v58 }
 0x567   : > { %v954_v24 = vadd.f32 %v951_v21, %v1881_v40 }
 0x568   : > { %v874_v25 = vadd.f32 %v871_v23, %v1881_v40 }
 0x569   : > { %v955_v26 = vsel %vm707_vm8, %v954_v24, -inf }
 0x56a   : > { %956 = vmax.xlane.f32.xlu2 %v955_v26  ;;  %v875_v27 = vsel %vm707_vm8, %v874_v25, -inf }
 0x56b   : > { %876 = vmax.xlane.f32.xlu0 %v875_v27  ;;  %v1481_v27 = vld [vmem:[%s2032_s9] ss:$0 sm:$0xff] }
 0x56c   : > { %v929_v28 = vpop.f32.mrf.mxu1 }
 0x56d   : > { %v872_v29 = vpop.f32.mrf.mxu3 }
 0x5dd   : > { %v957_v30 = vpop.xlane.xlu2 %956 }
 0x5de   : > { %v958_v31 = vsub.f32 %v954_v24, %v957_v30  ;;  %v877_v32 = vpop.xlane.xlu0 %876 }
 0x5df   : > { %v878_v33 = vsub.f32 %v874_v25, %v877_v32 }
 0x5e0   : > { %v959_v34 = vmul.f32 1.442695, %v958_v31 }
 0x5e1   : > { %v879_v35 = vmul.f32 1.442695, %v878_v33  ;;  %v1404_v33 = vld [vmem:[%s2036_s13 + $0x38] sm:$0xff] }
 0x5e2   : > { %1493 = vpow2.f32 %v959_v34  ;;  %1207 = vmatpush.bf16.msra.mxu2 %v1404_v33  ;;  %v1403_v34 = vld [vmem:[%s2036_s13 + $0x30] sm:$0xff] }
 0x5e3   : > { %1495 = vpow2.f32 %v879_v35  ;;  %v1402_v35 = vld [vmem:[%s2036_s13 + $0x28] sm:$0xff] }
 0x5e4   : > { %1497 = vrcp.f32 %v803_v42  ;;  %v1399_v42 = vld [vmem:[%s2036_s13 + $0x10] sm:$0xff] }
 0x5e6   : > { %1208 = vmatpush.bf16.msra.mxu2 %v1403_v34 }
 0x5e8   : > { %v1494_v36 = vpop.eup %1493 }
 0x5e9   : > { %v1496_v37 = vpop.eup %1495  ;;  %v964_v38 = vpack.c.bf16 %v1494_v36, %v1494_v36  ;;  %v961_v39 = vsel %vm707_vm8, %v1494_v36, 0.0  ;;  %v1401_v36 = vld [vmem:[%s2036_s13 + $0x20] sm:$0xff] }
 0x5ea   : > { %v884_v40 = vpack.c.bf16 %v1496_v37, %v1496_v37  ;;  %962 = vadd.xlane.f32.xlu0 %v961_v39  ;;  %v881_v41 = vsel %vm707_vm8, %v1496_v37, 0.0  ;;  %v1498_v44 = vpop.eup %1497  ;;  %1209 = vmatpush.bf16.msra.mxu2 %v1402_v35  ;;  %v1483_v37 = vld [vmem:[%s2035_s12] ss:$0 sm:$0xff]  ;;  %v1400_v39 = vld [vmem:[%s2036_s13 + $0x18] sm:$0xff] }
 0x5eb   : > { %1336 = vmatmul.msk.bf16.vlgmr.msra.gmra.mxu3 %vm707_vm8, %v964_v38  ;;  %882 = vadd.xlane.f32.xlu2 %v881_v41  ;;  %v827_v45 = vmul.f32 %v1498_v44, %v822_v18 }
 0x5ec   : > { %1333 = vmatmul.msk.bf16.vlgmr.msra.gmra.mxu0 %vm707_vm8, %v884_v40 }
 0x5ee   : > { %1210 = vmatpush.bf16.msra.mxu2 %v1401_v36 }
 0x5f2   : > { %1211 = vmatpush.bf16.msra.mxu2 %v1400_v39 }
 0x5f3   : > { %715 = vadd.xlane.f32.xlu2 %v714_v43 }
 0x5f6   : > { %1212 = vmatpush.bf16.msra.mxu2 %v1399_v42 }
 0x5fe   : > { %989 = vrot.lane.b32.xlu0 %v827_v45, %s1632_s27 }
 0x65d   : > { %v963_v47 = vpop.xlane.xlu0 %962 }
 0x65e   : > { %v883_v46 = vpop.xlane.xlu2 %882 }
 0x65f   : > { %1499 = vrcp.f32 %v883_v46  ;;  %v1398_v46 = vld [vmem:[%s2036_s13 + $0x8] sm:$0xff] }
 0x660   : > { %1501 = vrcp.f32 %v963_v47  ;;  %1213 = vmatpush.bf16.msra.mxu2 %v1398_v46 }
 0x665   : > { %v1500_v48 = vpop.eup %1499 }
 0x666   : > { %v1502_v52 = vpop.eup %1501  ;;  %v716_v59 = vpop.xlane.xlu2 %715 }
 0x667   : > { %1503 = vrcp.f32 %v716_v59 }
 0x669   : > { %v902_v49 = vpop.f32.mrf.mxu0 }
 0x66a   : > { %v907_v50 = vmul.f32 %v1500_v48, %v902_v49  ;;  %v1397_v48 = vld [vmem:[%s2036_s13] sm:$0xff] }
 0x66b   : > { %1214 = vmatpush.bf16.msra.mxu2 %v1397_v48 }
 0x66c   : > { %993 = vrot.lane.b32.xlu2 %v907_v50, %s1612_s22  ;;  %s1235_s22 = sshll.u32 %s511_s29, 4  ;;  %s1236_s22 = int_to_ptr.vmem [resolvable:$true] %s1235_s22 }
 0x66d   : > { %v1504_v60 = vpop.eup %1503 }
 0x66e   : > { %v982_v53 = vpop.f32.mrf.mxu3  ;;  %v744_v62 = vmul.f32 %v1504_v60, %v1897_v57 }
 0x66f   : > { %v987_v54 = vmul.f32 %v1502_v52, %v982_v53 }
 0x670   : > { %v990_v61 = vpop.permute.xlu0 %989 }
 0x671   : > { %v904_v55 = vpop.f32.mrf.mxu0  ;;  %997 = vrot.lane.b32.xlu0 %v987_v54, %s1633_s26  ;;  %v1000_v1 = vsel %vm707_vm8, %v744_v62, %v990_v61 }
 0x676   : > { %v984_v51 = vpop.f32.mrf.mxu3 }
 0x6c6   : > { %v994_v63 = vpop.permute.xlu2 %993 }
 0x6c7   : > { %v1002_v2 = vsel %vm1001_vm9, %v1000_v1, %v994_v63 }
 0x6e3   : > { %v998_v3 = vpop.permute.xlu0 %997 }
 0x6e4   : > { %v1004_v5 = vsel %vm1003_vm10, %v1002_v2, %v998_v3  ;;  %v1634_v3 = vmov -1.0  }
 0x6e5   : > { %v1005_v6 = vpack.c.bf16 %v1004_v5, %v1004_v5 }
 0x6e7   : > { %1345 = vmatmul.msk.bf16.vlgmr.msrb.gmra.mxu0 %vm516_vm0, %v1005_v6 }
 0x764   : > { %v1038_v9 = vpop.f32.mrf.mxu0 }
 0x765   : > { %v1039_v10 = vadd.f32 %v1480_v7, %v1038_v9 }
 0x767   : > { %v1935_v11 = vadd.f32 %v1039_v10, %v1811_v0  ;;  %v1395_v0 = vld [vmem:[%s2034_s11] sm:$0xff] }
 0x768   : > { %1106 = vmatpush.bf16.msrb.mxu1 %v1395_v0 }
 0x769   : > { %v1045_v57 = vsel %vm516_vm0, %v1935_v11, 0.0 }
 0x76a   : > { %1046 = vadd.xlane.f32.xlu1 %v1045_v57 }
 0x76c   : > { %v1040_v13 = vpop.f32.mrf.mxu0 }
 0x76d   : > { %v1484_v13 = vld [vmem:[%s2063_s16] ss:$0 sm:$0xff] }
 0x7dd   : > { %v1047_v14 = vpop.xlane.xlu1 %1046 }
 0x7de   : > { %v1048_v12 = vmul.f32 %v1047_v14, %v1815_v8 }
 0x7e0   : > { %v1049_v15 = vsub.f32 %v1935_v11, %v1048_v12 }
 0x7e2   : > { %v1050_v4 = vmul.f32 %v1049_v15, %v1049_v15 }
 0x7e4   : > { %v1051_v16 = vsel %vm516_vm0, %v1050_v4, 0.0 }
 0x7e5   : > { %1052 = vadd.xlane.f32.xlu0 %v1051_v16 }
 0x858   : > { %v1053_v18 = vpop.xlane.xlu0 %1052 }
 0x859   : > { %v1054_v19 = vmul.f32 %v1053_v18, %v1815_v8  ;;  %v1482_v8 = vld [vmem:[%s2033_s10] ss:$0 sm:$0xff] }
 0x85b   : > { %v1055_v20 = vadd.f32 1e-05, %v1054_v19 }
 0x85d   : > { %1505 = vrsqrt.f32 %v1055_v20  ;;  %vm1062_vm12 = vweird.f32 %v1055_v20 }
 0x863   : > { %v1506_v21 = vpop.eup %1505 }
 0x864   : > { %v1057_v22 = vmul.f32 %v1506_v21, %v1055_v20  ;;  %vm1063_vm11 = vweird.f32 %v1506_v21 }
 0x865   : > { %vm1064_vm13 = vmor %vm1062_vm12, %vm1063_vm11 }
 0x866   : > { %v1058_v23 = vmul.f32 %v1506_v21, %v1057_v22 }
 0x868   : > { %v1059_v24 = vmul.f32 0.5, %v1058_v23 }
 0x86a   : > { %v1060_v25 = vsub.f32 1.5, %v1059_v24 }
 0x86c   : > { %v1061_v26 = vmul.f32 %v1506_v21, %v1060_v25 }
 0x86e   : > { %v1065_v28 = vsel %vm1064_vm13, %v1506_v21, %v1061_v26 }
 0x86f   : > { %v1066_v29 = vmul.f32 %v1065_v28, %v1049_v15 }
 0x871   : > { %v1070_v30 = vmul.f32 %v1481_v27, %v1066_v29 }
 0x873   : > { %v1074_v31 = vadd.f32 %v1482_v8, %v1070_v30 }
 0x875   : > { %v1075_v32 = vpack.c.bf16 %v1074_v31, %v1074_v31 }
 0x877   : > { %1354 = vmatmul.msk.bf16.vlgmr.msrb.gmra.mxu1 %vm516_vm0, %v1075_v32 }
 0x8f4   : > { %v1108_v38 = vpop.f32.mrf.mxu1 }
 0x8f5   : > { %v1109_v40 = vadd.f32 %v1483_v37, %v1108_v38 }
 0x8f7   : > { %v1113_v41 = vmul.f32 0.70710677, %v1109_v40  ;;  %v1112_v7 = vmul.f32 0.5, %v1109_v40 }
 0x8f9   : > { %v1116_v43 = vand.u32 2147483647, %v1113_v41  ;;  %vm1114_vm14 = vcmp.ge.f32.partialorder %v1113_v41, 0.0 }
 0x8fa   : > { %v1115_v5 = vsel %vm1114_vm14, 1.0, %v1634_v3 }
 0x8fb   : > { %v1117_v44 = vmul.f32 0.3275911, %v1116_v43  ;;  %v1129_v50 = vsub.f32 0.0, %v1116_v43 }
 0x8fc   : > { %v1110_v45 = vpop.f32.mrf.mxu1 }
 0x8fd   : > { %v1118_v47 = vadd.f32 1.0, %v1117_v44  ;;  %v1130_v54 = vmul.f32 %v1129_v50, %v1116_v43 }
 0x8ff   : > { %1507 = vrcp.f32 %v1118_v47  ;;  %v1131_v56 = vmul.f32 1.442695, %v1130_v54 }
 0x901   : > { %1509 = vpow2.f32 %v1131_v56 }
 0x905   : > { %v1508_v49 = vpop.eup %1507 }
 0x906   : > { %v1120_v52 = vmul.f32 1.0614054, %v1508_v49 }
 0x907   : > { %v1510_v63 = vpop.eup %1509 }
 0x908   : > { %v1121_v53 = vadd.f32 -1.4531521, %v1120_v52 }
 0x90a   : > { %v1122_v55 = vmul.f32 %v1508_v49, %v1121_v53 }
 0x90c   : > { %v1123_v51 = vadd.f32 1.4214138, %v1122_v55 }
 0x90e   : > { %v1124_v58 = vmul.f32 %v1508_v49, %v1123_v51 }
 0x910   : > { %v1125_v59 = vadd.f32 -0.28449672, %v1124_v58 }
 0x912   : > { %v1126_v60 = vmul.f32 %v1508_v49, %v1125_v59 }
 0x914   : > { %v1127_v61 = vadd.f32 0.2548296, %v1126_v60 }
 0x916   : > { %v1128_v62 = vmul.f32 %v1508_v49, %v1127_v61 }
 0x918   : > { %v1133_v1 = vmul.f32 %v1510_v63, %v1128_v62 }
 0x91a   : > { %v1134_v2 = vsub.f32 1.0, %v1133_v1 }
 0x91c   : > { %v1135_v6 = vmul.f32 %v1134_v2, %v1115_v5 }
 0x91e   : > { %v1136_v9 = vadd.f32 1.0, %v1135_v6 }
 0x920   : > { %v1137_v10 = vmul.f32 %v1136_v9, %v1112_v7 }
 0x922   : > { %v1138_v57 = vpack.c.bf16 %v1137_v10, %v1137_v10 }
 0x924   : > { %1215 = vmatmul.bf16.vlgmr.msra.gmra.mxu2 %v1138_v57 }
 0x9a7   : > { %v1216_v14 = vpop.f32.mrf.mxu2 }
 0x9a8   : > { %v1217_v12 = vadd.f32 %v1484_v13, %v1216_v14 }
 0x9aa   : > { %v1220_v15 = vadd.f32 %v1217_v12, %v1935_v11 }
 0x9ac   : > { %1221 = vst.msk [vmem:[%s511_s29] sm:$0xff] %vm516_vm0, %v1220_v15 }
 0x9ad   : > { %1568 = shalt.err (!%p1565_p4)
}
 0x9ae   : > { %1407 = dma.vmem_to_hbm [thread:$0]  (%p1765_p11), %s1236_s22, 128, %s1238_s23, %s1223_s18  }
 0x9af   : > { %v1218_v11 = vpop.f32.mrf.mxu2 }
 0x9b0 PF: > { %s2066_s17 = sld [smem:[#allocation8_spill]]  ;;  %p2068_p7 = scmp.ge.s32.totalorder %s1607_s21, 2 }
 0x9b2   : > { %p1414_p5 = pnand %p2068_p7, %p1769_p12 }
 0x9b4   : > { %p1415_p8 = pneg %p1414_p5 }
 0x9b6   : > { %s1249_s29 = sand.u32 1, %s2066_s17  }
 0x9b7   : > { %s1250_s24 = scalar_lea.sflag [#allocation4], %s1249_s29 }
 0x9b8   : > { %1590 = dma.done.wait (%p1415_p8), %s1250_s24, 128  }
 0x9b9   : > { %1592 = vsyncadd (%p1415_p8), %s1250_s24, 4294967168  ;;  %s2069_s21 = sld [smem:[#allocation11_spill]]  ;;  %s2072_s18 = smov %s1599_s19 }
 0x9ba   : > { %s2070_s28 = sld [smem:[#allocation9_spill]] }
 0x9bb   : > { %s2071_s20 = sld [smem:[#allocation12_spill]] }
 0x9bf   : > { %p28_p10 = scmp.ge.s32.totalorder %s2069_s21, 4  }
 0x9c0   : > { %s2073_s19 = smov %s2070_s28 }
 0x9c1   :  { %30 = sbr.rel (!%p28_p10) target bundleno = 8 (0x8), region = 125 }
 0x9c6   :  { %1256 = vsyncpa [#allocation3], 1 }
 0x9c7   :  { %1258 = vsyncpa [#allocation3 + $0x1], 1 }
 0x9c8   :  { %1259 = vsyncpa [#allocation4], 1 }
 0x9c9   :  { %1261 = vsyncpa [#allocation4 + $0x1], 1 }

</bundles_post_ra>
